<compile_context>
chip_gen: v7x
topology: tpu7x:2x2x1
jax: 0.10.0
libtpu: 0.0.40
codegen_flags: <defaults>
</compile_context>

<pallas_src>
import functools

import jax
import jax.numpy as jnp
from jax import lax
from jax.experimental import pallas as pl
from jax.experimental.pallas import tpu as pltpu

# dtype of the MXU operands (activations & weights). Set to jnp.float32 for
# bit-strict numerics; bf16 is the fast MXU path and halves DMA bytes.
MXU_DTYPE = jnp.bfloat16

_VMEM_LIMIT = 48 * 1024 * 1024   # leaves headroom under v7x's 64 MiB physical VMEM
_BN_EPS = 1e-5


def _pick_row_chunk(hp, wp, target_rows=1024):
    """Largest divisor of hp whose chunk (chunk*wp im2col rows) stays <= target,
    bounding the in-kernel packed-operand footprint."""
    best = 1
    for d in range(1, hp + 1):
        if hp % d == 0 and d * wp <= target_rows:
            best = d
    return best


# ----------------------------------------------------------------------------
# Shared conv body: chunked im2col (packed once) -> single K=9*Cin MXU dot
# -> per-channel (sum, sum_sq) partials -> pre-BN output rows.
# ----------------------------------------------------------------------------
def _conv3x3_body(read_patch, w_ref, z_ref, st_ref, hp, wp, cin, row_chunk):
    cout = w_ref.shape[1]
    w = w_ref[...]                                    # (9*cin, cout) bf16
    s_acc = jnp.zeros((1, cout), jnp.float32)
    q_acc = jnp.zeros((1, cout), jnp.float32)
    rows = row_chunk * wp
    for ci in range(hp // row_chunk):
        h0 = ci * row_chunk
        # Pack the 9 taps ONCE into a (rows, 9*cin) operand (tap-major,
        # channel-minor: matches the (3,3,Cin,Cout)->(9*Cin,Cout) weight reshape),
        # then a single MXU dot with K = 9*cin.
        cols = jnp.concatenate(
            [read_patch(h0 + dy, dx).reshape(rows, cin)
             for dy in range(3) for dx in range(3)],
            axis=1)
        acc = jnp.dot(cols, w, preferred_element_type=jnp.float32)  # (rows, cout) f32
        s_acc = s_acc + jnp.sum(acc, axis=0, keepdims=True)
        q_acc = q_acc + jnp.sum(acc * acc, axis=0, keepdims=True)
        z_ref[0, h0 * wp:(h0 + row_chunk) * wp, :] = acc
    st_ref[0] = jnp.concatenate([s_acc, q_acc], axis=0)             # (2, cout)


# ----------------------------------------------------------------------------
# Stage 1 kernel: conv1 on the (pooled, zero-padded) input + BN1 partial stats.
# ----------------------------------------------------------------------------
def _conv1_stats_kernel(xpad_ref, w_ref, z_ref, st_ref, *, row_chunk):
    # xpad_ref: (1, hp+2, wp+2, cin) bf16  (one image)
    _, hpad, wpad, cin = xpad_ref.shape
    hp, wp = hpad - 2, wpad - 2

    def read_patch(hstart, dx):
        return xpad_ref[0, hstart:hstart + row_chunk, dx:dx + wp, :]

    _conv3x3_body(read_patch, w_ref, z_ref, st_ref, hp, wp, cin, row_chunk)


# ----------------------------------------------------------------------------
# Stage 2 kernel: BN1 (folded affine) + ReLU (stays in VMEM) -> zero-padded
# activation scratch -> conv2 (single K=9*Cmid dot) + BN2 partial stats.
# ----------------------------------------------------------------------------
def _bnrelu_conv2_stats_kernel(z1_ref, sc_ref, sh_ref, w_ref, z2_ref, st_ref,
                               pad_ref, *, row_chunk):
    # z1_ref : (1, hp*wp, cmid) f32 pre-BN conv1 output of one image
    # sc_ref / sh_ref: (1, cmid) folded BN1 scale / shift
    # pad_ref: (hp+2, wp+2, cmid) bf16 VMEM scratch
    hpad, wpad, cmid = pad_ref.shape
    hp, wp = hpad - 2, wpad - 2

    act = jnp.maximum(z1_ref[0] * sc_ref[...] + sh_ref[...], 0.0)   # f32, lane-dense
    # conv2 zero-pads AFTER BN+ReLU, so build the padded activation explicitly.
    pad_ref[...] = jnp.zeros(pad_ref.shape, pad_ref.dtype)
    pad_ref[1:hp + 1, 1:wp + 1, :] = act.reshape(hp, wp, cmid).astype(pad_ref.dtype)

    def read_patch(hstart, dx):
        return pad_ref[hstart:hstart + row_chunk, dx:dx + wp, :]

    _conv3x3_body(read_patch, w_ref, z2_ref, st_ref, hp, wp, cmid, row_chunk)


# ----------------------------------------------------------------------------
# pallas_call wrappers
# ----------------------------------------------------------------------------
def _conv1_stats_call(xpad, w1, hp, wp):
    n, _, _, cin = xpad.shape
    cmid = w1.shape[1]
    row_chunk = _pick_row_chunk(hp, wp)
    kern = functools.partial(_conv1_stats_kernel, row_chunk=row_chunk)
    return pl.pallas_call(
        kern,
        out_shape=(jax.ShapeDtypeStruct((n, hp * wp, cmid), jnp.float32),
                   jax.ShapeDtypeStruct((n, 2, cmid), jnp.float32)),
        grid=(n,),
        in_specs=[pl.BlockSpec((1, hp + 2, wp + 2, cin), lambda i: (i, 0, 0, 0)),
                  pl.BlockSpec((9 * cin, cmid), lambda i: (0, 0))],
        out_specs=(pl.BlockSpec((1, hp * wp, cmid), lambda i: (i, 0, 0)),
                   pl.BlockSpec((1, 2, cmid), lambda i: (i, 0, 0))),
        compiler_params=pltpu.CompilerParams(
            dimension_semantics=("parallel",),
            vmem_limit_bytes=_VMEM_LIMIT),
    )(xpad, w1)


def _bnrelu_conv2_stats_call(z1, scale1, shift1, w2, hp, wp):
    n, _, cmid = z1.shape
    cout = w2.shape[1]
    row_chunk = _pick_row_chunk(hp, wp)
    kern = functools.partial(_bnrelu_conv2_stats_kernel, row_chunk=row_chunk)
    return pl.pallas_call(
        kern,
        out_shape=(jax.ShapeDtypeStruct((n, hp * wp, cout), jnp.float32),
                   jax.ShapeDtypeStruct((n, 2, cout), jnp.float32)),
        grid=(n,),
        in_specs=[pl.BlockSpec((1, hp * wp, cmid), lambda i: (i, 0, 0)),
                  pl.BlockSpec((1, cmid), lambda i: (0, 0)),
                  pl.BlockSpec((1, cmid), lambda i: (0, 0)),
                  pl.BlockSpec((9 * cmid, cout), lambda i: (0, 0))],
        out_specs=(pl.BlockSpec((1, hp * wp, cout), lambda i: (i, 0, 0)),
                   pl.BlockSpec((1, 2, cout), lambda i: (i, 0, 0))),
        scratch_shapes=[pltpu.VMEM((hp + 2, wp + 2, cmid), MXU_DTYPE)],
        compiler_params=pltpu.CompilerParams(
            dimension_semantics=("parallel",),
            vmem_limit_bytes=_VMEM_LIMIT),
    )(z1, scale1, shift1, w2)


def _fold_bn(stats, gamma, beta, count, eps=_BN_EPS):
    """Reduce per-image (sum, sum_sq) partials to global batch stats and fold BN
    into a per-channel affine: y = z*scale + shift."""
    total = jnp.sum(stats[:, 0, :], axis=0)
    total_sq = jnp.sum(stats[:, 1, :], axis=0)
    mean = total / count
    var = jnp.maximum(total_sq / count - mean * mean, 0.0)   # biased var (BN training)
    scale = gamma * lax.rsqrt(var + eps)
    shift = beta - mean * scale
    return (scale.reshape(1, -1).astype(jnp.float32),
            shift.reshape(1, -1).astype(jnp.float32))


# ----------------------------------------------------------------------------
# Public forward: Down.forward(x), NCHW in / NCHW out.
# ----------------------------------------------------------------------------
def down_forward(x, params):
    n, cin, h, w = x.shape
    assert h % 2 == 0 and w % 2 == 0, "MaxPool2d(2) path assumes even H, W"
    hp, wp = h // 2, w // 2
    cmid = params["w1"].shape[-1]
    cout = params["w2"].shape[-1]

    # Prologue (XLA fuses into ~one pass over x): NCHW->NHWC, 2x2 maxpool,
    # zero-pad for conv1, cast to the MXU dtype.
    x_nhwc = jnp.transpose(x, (0, 2, 3, 1))
    pooled = jnp.max(x_nhwc.reshape(n, hp, 2, wp, 2, cin), axis=(2, 4))
    xpad = jnp.pad(pooled, ((0, 0), (1, 1), (1, 1), (0, 0))).astype(MXU_DTYPE)

    # Weights as single (9*Cin, Cout) matmul operands (tap-major, channel-minor,
    # matching the in-kernel im2col packing). No conv bias: exactly cancelled by
    # the following batch-statistics BatchNorm.
    w1 = params["w1"].reshape(9 * cin, cmid).astype(MXU_DTYPE)
    w2 = params["w2"].reshape(9 * cmid, cout).astype(MXU_DTYPE)

    count = n * hp * wp

    # Stage 1: conv1 (single K=9*Cin dot) + per-image BN1 partial stats.
    z1, st1 = _conv1_stats_call(xpad, w1, hp, wp)
    scale1, shift1 = _fold_bn(st1, params["g1"], params["be1"], count)

    # Stage 2: BN1+ReLU (folded affine, never leaves VMEM) + conv2 + BN2 stats.
    z2, st2 = _bnrelu_conv2_stats_call(z1, scale1, shift1, w2, hp, wp)
    scale2, shift2 = _fold_bn(st2, params["g2"], params["be2"], count)

    # Epilogue: BN2+ReLU, fused by XLA into the unavoidable NHWC->NCHW boundary
    # transpose (no extra HBM pass).
    y = jnp.maximum(z2 * scale2 + shift2, 0.0)
    return jnp.transpose(y.reshape(n, hp, wp, cout), (0, 3, 1, 2))


def init_params(key, in_channels, out_channels):
    """Deterministic synthetic parameters for Down(in_channels, out_channels)."""
    k = jax.random.split(key, 6)
    s1 = 1.0 / jnp.sqrt(in_channels * 9.0)
    s2 = 1.0 / jnp.sqrt(out_channels * 9.0)
    return {
        # conv weights in HWIO layout (3, 3, Cin, Cout); bias omitted (see above)
        "w1": jax.random.uniform(k[0], (3, 3, in_channels, out_channels),
                                 jnp.float32, -s1, s1),
        "g1": 1.0 + 0.1 * jax.random.normal(k[1], (out_channels,), jnp.float32),
        "be1": 0.1 * jax.random.normal(k[2], (out_channels,), jnp.float32),
        "w2": jax.random.uniform(k[3], (3, 3, out_channels, out_channels),
                                 jnp.float32, -s2, s2),
        "g2": 1.0 + 0.1 * jax.random.normal(k[4], (out_channels,), jnp.float32),
        "be2": 0.1 * jax.random.normal(k[5], (out_channels,), jnp.float32),
    }


# ----------------------------------------------------------------------------
# Pure-JAX reference (same operand rounding as the Pallas path) for validation.
# ----------------------------------------------------------------------------
def _ref_down(x, params, eps=_BN_EPS):
    def rnd(v):
        return v.astype(MXU_DTYPE).astype(jnp.float32)

    n, c, h, w = x.shape
    xn = jnp.transpose(x, (0, 2, 3, 1))
    a = jnp.max(xn.reshape(n, h // 2, 2, w // 2, 2, c), axis=(2, 4))

    def conv_bn_relu(a, wgt, g, b):
        apad = jnp.pad(rnd(a), ((0, 0), (1, 1), (1, 1), (0, 0)))
        z = lax.conv_general_dilated(
            apad, rnd(wgt), window_strides=(1, 1), padding="VALID",
            dimension_numbers=("NHWC", "HWIO", "NHWC"))
        mean = jnp.mean(z, axis=(0, 1, 2))
        var = jnp.mean((z - mean) ** 2, axis=(0, 1, 2))
        return jnp.maximum((z - mean) * lax.rsqrt(var + eps) * g + b, 0.0)

    a = conv_bn_relu(a, params["w1"], params["g1"], params["be1"])
    a = conv_bn_relu(a, params["w2"], params["g2"], params["be2"])
    return jnp.transpose(a, (0, 3, 1, 2))


if __name__ == "__main__":
    # Small but UNet-shaped Down block: Down(64, 128) on a (2, 64, 16, 16) input.
    n, in_channels, h, w = 2, 64, 16, 16
    out_channels = 128

    key = jax.random.PRNGKey(0)
    kx, kp = jax.random.split(key)
    x = jax.random.normal(kx, (n, in_channels, h, w), jnp.float32)
    params = init_params(kp, in_channels, out_channels)

    out = jax.block_until_ready(jax.jit(down_forward)(x, params))

    assert out.shape == (n, out_channels, h // 2, w // 2), out.shape
    assert bool(jnp.all(jnp.isfinite(out)))

    # Validate against the pure-JAX reference (same bf16 operand rounding).
    ref = jax.block_until_ready(jax.jit(_ref_down)(x, params))
    max_err = float(jnp.max(jnp.abs(out - ref)))
    assert max_err < 2e-2, f"mismatch vs reference: max abs err {max_err}"

    # TODO(synk): BatchNorm running_mean/running_var buffers are not produced
    # (training-mode batch statistics are used, matching the module's forward).
    print("KERNEL_OK")
</pallas_src>

<mosaic_0001>
module attributes {stable_mosaic.version = 11 : i64} {
  func.func @_conv1_stats_kernel(%arg0: i32, %arg1: memref<1x10x10x64xbf16, #tpu.memory_space<vmem>>, %arg2: memref<576x128xbf16, #tpu.memory_space<vmem>>, %arg3: memref<1x64x128xf32, #tpu.memory_space<vmem>>, %arg4: memref<1x2x128xf32, #tpu.memory_space<vmem>>) attributes {dimension_semantics = [#tpu.dimension_semantics<parallel>], iteration_bounds = array<i64: 2>, scalar_prefetch = 0 : i64, scratch_operands = 0 : i64, tpu.core_type = #tpu.core_type<tc>, window_params = [{transform_indices = @transform_0, window_bounds = array<i64: 1, 10, 10, 64>}, {pipeline_mode = #tpu.pipeline_mode<synchronous>, transform_indices = @transform_1, window_bounds = array<i64: 576, 128>}, {transform_indices = @transform_2, window_bounds = array<i64: 1, 64, 128>}, {transform_indices = @transform_3, window_bounds = array<i64: 1, 2, 128>}]} {
    %c0 = arith.constant 0 : index
    %c0_0 = arith.constant 0 : index
    %0 = vector.load %arg2[%c0, %c0_0] : memref<576x128xbf16, #tpu.memory_space<vmem>>, vector<576x128xbf16>
    %cst = arith.constant 0.000000e+00 : f32
    %1 = vector.broadcast %cst : f32 to vector<1x128xf32>
    %cst_1 = arith.constant 0.000000e+00 : f32
    %2 = vector.broadcast %cst_1 : f32 to vector<1x128xf32>
    %c0_2 = arith.constant 0 : index
    %c0_3 = arith.constant 0 : index
    %c0_4 = arith.constant 0 : index
    %c0_5 = arith.constant 0 : index
    %3 = vector.load %arg1[%c0_2, %c0_3, %c0_4, %c0_5] : memref<1x10x10x64xbf16, #tpu.memory_space<vmem>>, vector<1x8x8x64xbf16>
    %4 = vector.shape_cast %3 : vector<1x8x8x64xbf16> to vector<8x8x64xbf16>
    %5 = vector.shape_cast %4 : vector<8x8x64xbf16> to vector<64x64xbf16>
    %c0_6 = arith.constant 0 : index
    %c0_7 = arith.constant 0 : index
    %c1 = arith.constant 1 : index
    %c0_8 = arith.constant 0 : index
    %6 = vector.load %arg1[%c0_6, %c0_7, %c1, %c0_8] : memref<1x10x10x64xbf16, #tpu.memory_space<vmem>>, vector<1x8x8x64xbf16>
    %7 = vector.shape_cast %6 : vector<1x8x8x64xbf16> to vector<8x8x64xbf16>
    %8 = vector.shape_cast %7 : vector<8x8x64xbf16> to vector<64x64xbf16>
    %c0_9 = arith.constant 0 : index
    %c0_10 = arith.constant 0 : index
    %c2 = arith.constant 2 : index
    %c0_11 = arith.constant 0 : index
    %9 = vector.load %arg1[%c0_9, %c0_10, %c2, %c0_11] : memref<1x10x10x64xbf16, #tpu.memory_space<vmem>>, vector<1x8x8x64xbf16>
    %10 = vector.shape_cast %9 : vector<1x8x8x64xbf16> to vector<8x8x64xbf16>
    %11 = vector.shape_cast %10 : vector<8x8x64xbf16> to vector<64x64xbf16>
    %c0_12 = arith.constant 0 : index
    %c1_13 = arith.constant 1 : index
    %c0_14 = arith.constant 0 : index
    %c0_15 = arith.constant 0 : index
    %12 = vector.load %arg1[%c0_12, %c1_13, %c0_14, %c0_15] : memref<1x10x10x64xbf16, #tpu.memory_space<vmem>>, vector<1x8x8x64xbf16>
    %13 = vector.shape_cast %12 : vector<1x8x8x64xbf16> to vector<8x8x64xbf16>
    %14 = vector.shape_cast %13 : vector<8x8x64xbf16> to vector<64x64xbf16>
    %c0_16 = arith.constant 0 : index
    %c1_17 = arith.constant 1 : index
    %c1_18 = arith.constant 1 : index
    %c0_19 = arith.constant 0 : index
    %15 = vector.load %arg1[%c0_16, %c1_17, %c1_18, %c0_19] : memref<1x10x10x64xbf16, #tpu.memory_space<vmem>>, vector<1x8x8x64xbf16>
    %16 = vector.shape_cast %15 : vector<1x8x8x64xbf16> to vector<8x8x64xbf16>
    %17 = vector.shape_cast %16 : vector<8x8x64xbf16> to vector<64x64xbf16>
    %c0_20 = arith.constant 0 : index
    %c1_21 = arith.constant 1 : index
    %c2_22 = arith.constant 2 : index
    %c0_23 = arith.constant 0 : index
    %18 = vector.load %arg1[%c0_20, %c1_21, %c2_22, %c0_23] : memref<1x10x10x64xbf16, #tpu.memory_space<vmem>>, vector<1x8x8x64xbf16>
    %19 = vector.shape_cast %18 : vector<1x8x8x64xbf16> to vector<8x8x64xbf16>
    %20 = vector.shape_cast %19 : vector<8x8x64xbf16> to vector<64x64xbf16>
    %c0_24 = arith.constant 0 : index
    %c2_25 = arith.constant 2 : index
    %c0_26 = arith.constant 0 : index
    %c0_27 = arith.constant 0 : index
    %21 = vector.load %arg1[%c0_24, %c2_25, %c0_26, %c0_27] : memref<1x10x10x64xbf16, #tpu.memory_space<vmem>>, vector<1x8x8x64xbf16>
    %22 = vector.shape_cast %21 : vector<1x8x8x64xbf16> to vector<8x8x64xbf16>
    %23 = vector.shape_cast %22 : vector<8x8x64xbf16> to vector<64x64xbf16>
    %c0_28 = arith.constant 0 : index
    %c2_29 = arith.constant 2 : index
    %c1_30 = arith.constant 1 : index
    %c0_31 = arith.constant 0 : index
    %24 = vector.load %arg1[%c0_28, %c2_29, %c1_30, %c0_31] : memref<1x10x10x64xbf16, #tpu.memory_space<vmem>>, vector<1x8x8x64xbf16>
    %25 = vector.shape_cast %24 : vector<1x8x8x64xbf16> to vector<8x8x64xbf16>
    %26 = vector.shape_cast %25 : vector<8x8x64xbf16> to vector<64x64xbf16>
    %c0_32 = arith.constant 0 : index
    %c2_33 = arith.constant 2 : index
    %c2_34 = arith.constant 2 : index
    %c0_35 = arith.constant 0 : index
    %27 = vector.load %arg1[%c0_32, %c2_33, %c2_34, %c0_35] : memref<1x10x10x64xbf16, #tpu.memory_space<vmem>>, vector<1x8x8x64xbf16>
    %28 = vector.shape_cast %27 : vector<1x8x8x64xbf16> to vector<8x8x64xbf16>
    %29 = vector.shape_cast %28 : vector<8x8x64xbf16> to vector<64x64xbf16>
    %30 = tpu.concatenate %5, %8, %11, %14, %17, %20, %23, %26, %29 in 1 : vector<64x64xbf16>, vector<64x64xbf16>, vector<64x64xbf16>, vector<64x64xbf16>, vector<64x64xbf16>, vector<64x64xbf16>, vector<64x64xbf16>, vector<64x64xbf16>, vector<64x64xbf16> -> vector<64x576xbf16>
    %cst_36 = arith.constant dense<0.000000e+00> : vector<64x128xf32>
    %31 = tpu.matmul %30, %0, %cst_36 {dimension_numbers = #tpu.dot_dimension_numbers<[1], [0], [0], [1], [0, 0, 1, 1], [], []>} : vector<64x576xbf16>, vector<576x128xbf16>, vector<64x128xf32> -> vector<64x128xf32>
    %cst_37 = arith.constant dense<0.000000e+00> : vector<128xf32>
    %32 = vector.multi_reduction <add>, %31, %cst_37 [0] : vector<64x128xf32> to vector<128xf32>
    %33 = vector.shape_cast %32 : vector<128xf32> to vector<1x128xf32>
    %34 = arith.addf %1, %33 : vector<1x128xf32>
    %35 = arith.mulf %31, %31 : vector<64x128xf32>
    %cst_38 = arith.constant dense<0.000000e+00> : vector<128xf32>
    %36 = vector.multi_reduction <add>, %35, %cst_38 [0] : vector<64x128xf32> to vector<128xf32>
    %37 = vector.shape_cast %36 : vector<128xf32> to vector<1x128xf32>
    %38 = arith.addf %2, %37 : vector<1x128xf32>
    %c0_39 = arith.constant 0 : index
    %c0_40 = arith.constant 0 : index
    %c0_41 = arith.constant 0 : index
    %39 = vector.load %arg3[%c0_39, %c0_40, %c0_41] : memref<1x64x128xf32, #tpu.memory_space<vmem>>, vector<1x64x128xf32>
    %40 = vector.shape_cast %39 : vector<1x64x128xf32> to vector<64x128xf32>
    %41 = vector.shape_cast %31 : vector<64x128xf32> to vector<1x64x128xf32>
    tpu.vector_store %arg3[%c0_39, %c0_40, %c0_41], %41 {strides = array<i32>} : memref<1x64x128xf32, #tpu.memory_space<vmem>>, vector<1x64x128xf32>,
    %42 = tpu.concatenate %34, %38 in 0 : vector<1x128xf32>, vector<1x128xf32> -> vector<2x128xf32>
    %c0_42 = arith.constant 0 : index
    %c0_43 = arith.constant 0 : index
    %c0_44 = arith.constant 0 : index
    %43 = vector.load %arg4[%c0_42, %c0_43, %c0_44] : memref<1x2x128xf32, #tpu.memory_space<vmem>>, vector<1x2x128xf32>
    %44 = vector.shape_cast %43 : vector<1x2x128xf32> to vector<2x128xf32>
    %45 = vector.shape_cast %42 : vector<2x128xf32> to vector<1x2x128xf32>
    tpu.vector_store %arg4[%c0_42, %c0_43, %c0_44], %45 {strides = array<i32>} : memref<1x2x128xf32, #tpu.memory_space<vmem>>, vector<1x2x128xf32>,
    return
  }
  func.func @transform_0(%arg0: i32) -> (i32, i32, i32, i32) {
    %c0_i32 = arith.constant 0 : i32
    %c0_i32_0 = arith.constant 0 : i32
    %c0_i32_1 = arith.constant 0 : i32
    %c0_i32_2 = arith.constant 0 : i32
    return %arg0, %c0_i32, %c0_i32_0, %c0_i32_1 : i32, i32, i32, i32
  }
  func.func @transform_1(%arg0: i32) -> (i32, i32) {
    %c0_i32 = arith.constant 0 : i32
    %c0_i32_0 = arith.constant 0 : i32
    %c0_i32_1 = arith.constant 0 : i32
    return %c0_i32, %c0_i32_0 : i32, i32
  }
  func.func @transform_2(%arg0: i32) -> (i32, i32, i32) {
    %c0_i32 = arith.constant 0 : i32
    %c0_i32_0 = arith.constant 0 : i32
    %c0_i32_1 = arith.constant 0 : i32
    return %arg0, %c0_i32, %c0_i32_0 : i32, i32, i32
  }
  func.func @transform_3(%arg0: i32) -> (i32, i32, i32) {
    %c0_i32 = arith.constant 0 : i32
    %c0_i32_0 = arith.constant 0 : i32
    %c0_i32_1 = arith.constant 0 : i32
    return %arg0, %c0_i32, %c0_i32_0 : i32, i32, i32
  }
}

module attributes {stable_mosaic.version = 11 : i64} {
  func.func @_bnrelu_conv2_stats_kernel(%arg0: i32, %arg1: memref<1x64x128xf32, #tpu.memory_space<vmem>>, %arg2: memref<1x128xf32, #tpu.memory_space<vmem>>, %arg3: memref<1x128xf32, #tpu.memory_space<vmem>>, %arg4: memref<1152x128xbf16, #tpu.memory_space<vmem>>, %arg5: memref<1x64x128xf32, #tpu.memory_space<vmem>>, %arg6: memref<1x2x128xf32, #tpu.memory_space<vmem>>, %arg7: memref<10x10x128xbf16, #tpu.memory_space<vmem>>) attributes {dimension_semantics = [#tpu.dimension_semantics<parallel>], iteration_bounds = array<i64: 2>, scalar_prefetch = 0 : i64, scratch_operands = 1 : i64, tpu.core_type = #tpu.core_type<tc>, window_params = [{transform_indices = @transform_0, window_bounds = array<i64: 1, 64, 128>}, {pipeline_mode = #tpu.pipeline_mode<synchronous>, transform_indices = @transform_1, window_bounds = array<i64: 1, 128>}, {pipeline_mode = #tpu.pipeline_mode<synchronous>, transform_indices = @transform_2, window_bounds = array<i64: 1, 128>}, {pipeline_mode = #tpu.pipeline_mode<synchronous>, transform_indices = @transform_3, window_bounds = array<i64: 1152, 128>}, {transform_indices = @transform_4, window_bounds = array<i64: 1, 64, 128>}, {transform_indices = @transform_5, window_bounds = array<i64: 1, 2, 128>}]} {
    %c0 = arith.constant 0 : index
    %c0_0 = arith.constant 0 : index
    %c0_1 = arith.constant 0 : index
    %0 = vector.load %arg1[%c0, %c0_0, %c0_1] : memref<1x64x128xf32, #tpu.memory_space<vmem>>, vector<1x64x128xf32>
    %1 = vector.shape_cast %0 : vector<1x64x128xf32> to vector<64x128xf32>
    %c0_2 = arith.constant 0 : index
    %c0_3 = arith.constant 0 : index
    %2 = vector.load %arg2[%c0_2, %c0_3] : memref<1x128xf32, #tpu.memory_space<vmem>>, vector<1x128xf32>
    %3 = vector.broadcast %2 : vector<1x128xf32> to vector<64x128xf32>
    %4 = arith.mulf %1, %3 : vector<64x128xf32>
    %c0_4 = arith.constant 0 : index
    %c0_5 = arith.constant 0 : index
    %5 = vector.load %arg3[%c0_4, %c0_5] : memref<1x128xf32, #tpu.memory_space<vmem>>, vector<1x128xf32>
    %6 = vector.broadcast %5 : vector<1x128xf32> to vector<64x128xf32>
    %7 = arith.addf %4, %6 : vector<64x128xf32>
    %cst = arith.constant 0.000000e+00 : f32
    %8 = vector.broadcast %cst : f32 to vector<64x128xf32>
    %9 = arith.maximumf %7, %8 : vector<64x128xf32>
    %cst_6 = arith.constant 0.000000e+00 : bf16
    %10 = vector.broadcast %cst_6 : bf16 to vector<10x10x128xbf16>
    %c0_7 = arith.constant 0 : index
    %c0_8 = arith.constant 0 : index
    %c0_9 = arith.constant 0 : index
    %11 = vector.load %arg7[%c0_7, %c0_8, %c0_9] : memref<10x10x128xbf16, #tpu.memory_space<vmem>>, vector<10x10x128xbf16>
    tpu.vector_store %arg7[%c0_7, %c0_8, %c0_9], %10 {strides = array<i32>} : memref<10x10x128xbf16, #tpu.memory_space<vmem>>, vector<10x10x128xbf16>,
    %12 = vector.shape_cast %9 : vector<64x128xf32> to vector<8x8x128xf32>
    %13 = arith.truncf %12 : vector<8x8x128xf32> to vector<8x8x128xbf16>
    %c1 = arith.constant 1 : index
    %c1_10 = arith.constant 1 : index
    %c0_11 = arith.constant 0 : index
    %14 = vector.load %arg7[%c1, %c1_10, %c0_11] : memref<10x10x128xbf16, #tpu.memory_space<vmem>>, vector<8x8x128xbf16>
    tpu.vector_store %arg7[%c1, %c1_10, %c0_11], %13 {strides = array<i32>} : memref<10x10x128xbf16, #tpu.memory_space<vmem>>, vector<8x8x128xbf16>,
    %c0_12 = arith.constant 0 : index
    %c0_13 = arith.constant 0 : index
    %15 = vector.load %arg4[%c0_12, %c0_13] : memref<1152x128xbf16, #tpu.memory_space<vmem>>, vector<1152x128xbf16>
    %cst_14 = arith.constant 0.000000e+00 : f32
    %16 = vector.broadcast %cst_14 : f32 to vector<1x128xf32>
    %cst_15 = arith.constant 0.000000e+00 : f32
    %17 = vector.broadcast %cst_15 : f32 to vector<1x128xf32>
    %c0_16 = arith.constant 0 : index
    %c0_17 = arith.constant 0 : index
    %c0_18 = arith.constant 0 : index
    %18 = vector.load %arg7[%c0_16, %c0_17, %c0_18] : memref<10x10x128xbf16, #tpu.memory_space<vmem>>, vector<8x8x128xbf16>
    %19 = vector.shape_cast %18 : vector<8x8x128xbf16> to vector<64x128xbf16>
    %c0_19 = arith.constant 0 : index
    %c1_20 = arith.constant 1 : index
    %c0_21 = arith.constant 0 : index
    %20 = vector.load %arg7[%c0_19, %c1_20, %c0_21] : memref<10x10x128xbf16, #tpu.memory_space<vmem>>, vector<8x8x128xbf16>
    %21 = vector.shape_cast %20 : vector<8x8x128xbf16> to vector<64x128xbf16>
    %c0_22 = arith.constant 0 : index
    %c2 = arith.constant 2 : index
    %c0_23 = arith.constant 0 : index
    %22 = vector.load %arg7[%c0_22, %c2, %c0_23] : memref<10x10x128xbf16, #tpu.memory_space<vmem>>, vector<8x8x128xbf16>
    %23 = vector.shape_cast %22 : vector<8x8x128xbf16> to vector<64x128xbf16>
    %c1_24 = arith.constant 1 : index
    %c0_25 = arith.constant 0 : index
    %c0_26 = arith.constant 0 : index
    %24 = vector.load %arg7[%c1_24, %c0_25, %c0_26] : memref<10x10x128xbf16, #tpu.memory_space<vmem>>, vector<8x8x128xbf16>
    %25 = vector.shape_cast %24 : vector<8x8x128xbf16> to vector<64x128xbf16>
    %c1_27 = arith.constant 1 : index
    %c1_28 = arith.constant 1 : index
    %c0_29 = arith.constant 0 : index
    %26 = vector.load %arg7[%c1_27, %c1_28, %c0_29] : memref<10x10x128xbf16, #tpu.memory_space<vmem>>, vector<8x8x128xbf16>
    %27 = vector.shape_cast %26 : vector<8x8x128xbf16> to vector<64x128xbf16>
    %c1_30 = arith.constant 1 : index
    %c2_31 = arith.constant 2 : index
    %c0_32 = arith.constant 0 : index
    %28 = vector.load %arg7[%c1_30, %c2_31, %c0_32] : memref<10x10x128xbf16, #tpu.memory_space<vmem>>, vector<8x8x128xbf16>
    %29 = vector.shape_cast %28 : vector<8x8x128xbf16> to vector<64x128xbf16>
    %c2_33 = arith.constant 2 : index
    %c0_34 = arith.constant 0 : index
    %c0_35 = arith.constant 0 : index
    %30 = vector.load %arg7[%c2_33, %c0_34, %c0_35] : memref<10x10x128xbf16, #tpu.memory_space<vmem>>, vector<8x8x128xbf16>
    %31 = vector.shape_cast %30 : vector<8x8x128xbf16> to vector<64x128xbf16>
    %c2_36 = arith.constant 2 : index
    %c1_37 = arith.constant 1 : index
    %c0_38 = arith.constant 0 : index
    %32 = vector.load %arg7[%c2_36, %c1_37, %c0_38] : memref<10x10x128xbf16, #tpu.memory_space<vmem>>, vector<8x8x128xbf16>
    %33 = vector.shape_cast %32 : vector<8x8x128xbf16> to vector<64x128xbf16>
    %c2_39 = arith.constant 2 : index
    %c2_40 = arith.constant 2 : index
    %c0_41 = arith.constant 0 : index
    %34 = vector.load %arg7[%c2_39, %c2_40, %c0_41] : memref<10x10x128xbf16, #tpu.memory_space<vmem>>, vector<8x8x128xbf16>
    %35 = vector.shape_cast %34 : vector<8x8x128xbf16> to vector<64x128xbf16>
    %36 = tpu.concatenate %19, %21, %23, %25, %27, %29, %31, %33, %35 in 1 : vector<64x128xbf16>, vector<64x128xbf16>, vector<64x128xbf16>, vector<64x128xbf16>, vector<64x128xbf16>, vector<64x128xbf16>, vector<64x128xbf16>, vector<64x128xbf16>, vector<64x128xbf16> -> vector<64x1152xbf16>
    %cst_42 = arith.constant dense<0.000000e+00> : vector<64x128xf32>
    %37 = tpu.matmul %36, %15, %cst_42 {dimension_numbers = #tpu.dot_dimension_numbers<[1], [0], [0], [1], [0, 0, 1, 1], [], []>} : vector<64x1152xbf16>, vector<1152x128xbf16>, vector<64x128xf32> -> vector<64x128xf32>
    %cst_43 = arith.constant dense<0.000000e+00> : vector<128xf32>
    %38 = vector.multi_reduction <add>, %37, %cst_43 [0] : vector<64x128xf32> to vector<128xf32>
    %39 = vector.shape_cast %38 : vector<128xf32> to vector<1x128xf32>
    %40 = arith.addf %16, %39 : vector<1x128xf32>
    %41 = arith.mulf %37, %37 : vector<64x128xf32>
    %cst_44 = arith.constant dense<0.000000e+00> : vector<128xf32>
    %42 = vector.multi_reduction <add>, %41, %cst_44 [0] : vector<64x128xf32> to vector<128xf32>
    %43 = vector.shape_cast %42 : vector<128xf32> to vector<1x128xf32>
    %44 = arith.addf %17, %43 : vector<1x128xf32>
    %c0_45 = arith.constant 0 : index
    %c0_46 = arith.constant 0 : index
    %c0_47 = arith.constant 0 : index
    %45 = vector.load %arg5[%c0_45, %c0_46, %c0_47] : memref<1x64x128xf32, #tpu.memory_space<vmem>>, vector<1x64x128xf32>
    %46 = vector.shape_cast %45 : vector<1x64x128xf32> to vector<64x128xf32>
    %47 = vector.shape_cast %37 : vector<64x128xf32> to vector<1x64x128xf32>
    tpu.vector_store %arg5[%c0_45, %c0_46, %c0_47], %47 {strides = array<i32>} : memref<1x64x128xf32, #tpu.memory_space<vmem>>, vector<1x64x128xf32>,
    %48 = tpu.concatenate %40, %44 in 0 : vector<1x128xf32>, vector<1x128xf32> -> vector<2x128xf32>
    %c0_48 = arith.constant 0 : index
    %c0_49 = arith.constant 0 : index
    %c0_50 = arith.constant 0 : index
    %49 = vector.load %arg6[%c0_48, %c0_49, %c0_50] : memref<1x2x128xf32, #tpu.memory_space<vmem>>, vector<1x2x128xf32>
    %50 = vector.shape_cast %49 : vector<1x2x128xf32> to vector<2x128xf32>
    %51 = vector.shape_cast %48 : vector<2x128xf32> to vector<1x2x128xf32>
    tpu.vector_store %arg6[%c0_48, %c0_49, %c0_50], %51 {strides = array<i32>} : memref<1x2x128xf32, #tpu.memory_space<vmem>>, vector<1x2x128xf32>,
    return
  }
  func.func @transform_0(%arg0: i32) -> (i32, i32, i32) {
    %c0_i32 = arith.constant 0 : i32
    %c0_i32_0 = arith.constant 0 : i32
    %c0_i32_1 = arith.constant 0 : i32
    return %arg0, %c0_i32, %c0_i32_0 : i32, i32, i32
  }
  func.func @transform_1(%arg0: i32) -> (i32, i32) {
    %c0_i32 = arith.constant 0 : i32
    %c0_i32_0 = arith.constant 0 : i32
    %c0_i32_1 = arith.constant 0 : i32
    return %c0_i32, %c0_i32_0 : i32, i32
  }
  func.func @transform_2(%arg0: i32) -> (i32, i32) {
    %c0_i32 = arith.constant 0 : i32
    %c0_i32_0 = arith.constant 0 : i32
    %c0_i32_1 = arith.constant 0 : i32
    return %c0_i32, %c0_i32_0 : i32, i32
  }
  func.func @transform_3(%arg0: i32) -> (i32, i32) {
    %c0_i32 = arith.constant 0 : i32
    %c0_i32_0 = arith.constant 0 : i32
    %c0_i32_1 = arith.constant 0 : i32
    return %c0_i32, %c0_i32_0 : i32, i32
  }
  func.func @transform_4(%arg0: i32) -> (i32, i32, i32) {
    %c0_i32 = arith.constant 0 : i32
    %c0_i32_0 = arith.constant 0 : i32
    %c0_i32_1 = arith.constant 0 : i32
    return %arg0, %c0_i32, %c0_i32_0 : i32, i32, i32
  }
  func.func @transform_5(%arg0: i32) -> (i32, i32, i32) {
    %c0_i32 = arith.constant 0 : i32
    %c0_i32_0 = arith.constant 0 : i32
    %c0_i32_1 = arith.constant 0 : i32
    return %arg0, %c0_i32, %c0_i32_0 : i32, i32, i32
  }
}

</mosaic_0001>

<bundles_post_ra>
// kernel: down_forward.2
= control target key start
LH: loop header
LB: loop body
LE: loop exit
PB: predicated region body
PF: predicated region fallthrough
CT: control target
= control target key end

     0   :  { %s1959_s12 = smov 0   ;;  %s2658_s0 = inlined_call_operand.vmem [shape: bf16[2,10,10,64], index: 0, kind: input, shape index: {}]   ;;  %s2659_s1 = inlined_call_operand.vmem [shape: bf16[576,128], index: 1, kind: input, shape index: {}]   ;;  %s2660_s2 = inlined_call_operand.vmem [shape: f32[2,64,128], index: 2, kind: output, shape index: {0}]   ;;  %s2661_s3 = inlined_call_operand.vmem [shape: f32[2,2,128], index: 3, kind: output, shape index: {1}]  }
   0x1 LB: > { %s1600_s13 = sadd.s32 4294967295, %s1936_s12   ;;  %p1604_p0 = scmp.ge.s32.totalorder %s1936_s12, 1  ;;  %s1936_s12 = sphi %s1959_s12, %s14_s12  }
   0x2   : > { %p140_p1 = scmp.lt.s32.totalorder %s1936_s12, 3 }
   0x4   : > { %p141_p2 = pnand %p1604_p0, %p140_p1 }
   0x6   : > { %144 = sbr.rel (%p141_p2) target bundleno = 450 (0x1c2), region = 28 }
   0xd   : > { %p168_p3 = scmp.lt.s32.totalorder %s1600_s13, 1  ;;  %v1886_v0 = vld [vmem:[%s2659_s1 + $0x40] sm:$0xff]   ;;  %v1888_v2 = vld [vmem:[%s2659_s1 + $0x48] sm:$0xff]   ;;  %vm271_vm0 = vsmask.f32 3328  ;;  %v1892_v19 = vld [vmem:[%s2659_s1 + $0x50] sm:$0xff]  }
   0xe   : > { %v1887_v1 = vld [vmem:[%s2659_s1] sm:$0xff]   ;;  %1760 = vmatprep.subr.bf16.mxu0 %v1886_v0  ;;  %v1889_v3 = vld [vmem:[%s2659_s1 + $0x8] sm:$0xff]   ;;  %vm272_vm1 = vsmask.f32 7440  ;;  %s1938_s5 = smov 64   ;;  %vm410_vm2 = vcmask 1042432  }
   0xf   : > { %s2712_s13 = smov (!%p168_p3, %s1600_s13), 1  ;;  %1761 = vmatpush3.bf16.msra.mxu0 %v1887_v1  ;;  %v1890_v4 = vld [vmem:[%s2659_s1 + $0xc0] sm:$0xff]   ;;  %vm411_vm3 = vcmask 1046532   ;;  %v1893_v34 = vld [vmem:[%s2659_s1 + $0x10] sm:$0xff]   ;;  %v1894_v50 = vld [vmem:[%s2659_s1 + $0xc8] sm:$0xff]   ;;  %vm979_vm6 = vcmask 523264  }
  0x10   : > { %s1872_s18 = smul.u32 80, %s2712_s13  ;;  %1762 = vmatprep.subr.bf16.mxu0 %v1888_v2  ;;  %1800 = vmatprep.subr.bf16.mxu1 %v1890_v4  ;;  %v1891_v13 = vld [vmem:[%s2659_s1 + $0x80] sm:$0xff]   ;;  %v1895_v56 = vld [vmem:[%s2659_s1 + $0x88] sm:$0xff]   ;;  %vm2054_vm4 = vmor %vm271_vm0, %vm272_vm1  ;;  %s1608_s22 = sshll.u32 %s2712_s13, 1  ;;  %vm1511_vm7 = vcmask 1040384  }
  0x11   : > { %1801 = vmatpush3.bf16.msra.mxu1 %v1891_v13  ;;  %vm2078_vm5 = vmor %vm410_vm2, %vm411_vm3  ;;  %s181_s26 = scalar_lea.vmem %s2661_s3, %s1608_s22 }
  0x12   : > { %s1985_s25 = scalar_lea.vmem %s2658_s0, %s1872_s18  ;;  %1802 = vmatprep.subr.bf16.mxu1 %v1894_v50  ;;  %s1759_s18 = sshll.u32 %s2712_s13, 6 }
  0x13   : > { %v1619_v5 = vld [vmem:[%s1985_s25 + $0x18] sm:$0xf]  ;;  %v1620_v6 = vld [vmem:[%s1985_s25 + $0x20] sm:$0xf]  ;;  %v1617_v7 = vld [vmem:[%s1985_s25 + $0x8] sm:$0xf]  ;;  %1763 = vmatpush3.bf16.msra.mxu0 %v1889_v3  ;;  %s2641_s21 = scalar_lea.vmem %s2660_s2, %s1759_s18 }
  0x14   : > { %v505_v8 = vshrl.u32 %v1620_v6, 16  ;;  %v508_v9 = vshll.u32 %v1620_v6, 16  ;;  %v1694_v10 = vcombine.low %v1619_v5, %v1620_v6  ;;  %v491_v11 = vshrl.u32 %v1619_v5, 16  ;;  %v1618_v12 = vld [vmem:[%s1985_s25 + $0x10] sm:$0xf]  ;;  %1764 = vmatprep.subr.bf16.mxu0 %v1892_v19 }
  0x15   : > { %v494_v14 = vshll.u32 %v1619_v5, 16  ;;  %v477_v15 = vshrl.u32 %v1618_v12, 16  ;;  %v480_v16 = vshll.u32 %v1618_v12, 16  ;;  %v1693_v17 = vcombine.low %v1617_v7, %v1618_v12  ;;  %v1998_v18 = vld [vmem:[%s1985_s25 + $0x10] sm:$0xf]  ;;  %1803 = vmatpush3.bf16.msra.mxu1 %v1895_v56 }
  0x16   : > { %v507_v20 = vrot.slane %v505_v8, 4  ;;  %v510_v21 = vrot.slane %v508_v9, 5  ;;  %889 = vrot.lane.b32.xlu1 %v1694_v10, %s1938_s5  ;;  %v493_v22 = vrot.slane %v491_v11, 4  ;;  %v463_v23 = vshrl.u32 %v1617_v7, 16  ;;  %v2005_v24 = vld [vmem:[%s1985_s25 + $0x18] sm:$0xf] }
  0x17   : > { %v496_v25 = vrot.slane %v494_v14, 5  ;;  %v479_v26 = vrot.slane %v477_v15, 4  ;;  %v482_v27 = vrot.slane %v480_v16, 5  ;;  %887 = vrot.lane.b32.xlu0 %v1693_v17, %s1938_s5  ;;  %v466_v28 = vshll.u32 %v1617_v7, 16  ;;  %v2009_v29 = vld [vmem:[%s1985_s25 + $0x14] sm:$0x1]  ;;  %1765 = vmatpush3.bf16.msra.mxu0 %v1893_v34 }
  0x18   : > { %2669 = vst [vmem:[#allocation2_spill] sm:$0xff] %v2009_v29  ;;  %v511_v30 = vor.u32 %v510_v21, %v507_v20  ;;  %v465_v31 = vrot.slane %v463_v23, 4  ;;  %v648_v32 = vshrl.u32 %v1998_v18, 16  ;;  %v651_v33 = vshll.u32 %v1998_v18, 16  ;;  %v2017_v38 = vld [vmem:[%s1985_s25 + $0x1c] sm:$0x1] }
  0x19   : > { %v497_v35 = vor.u32 %v496_v25, %v493_v22  ;;  %v483_v36 = vor.u32 %v482_v27, %v479_v26  ;;  %v468_v37 = vrot.slane %v466_v28, 5  ;;  %2670 = vst [vmem:[#allocation3_spill] sm:$0xff] %v2017_v38  ;;  %v657_v39 = vshll.u32 %v2009_v29, 16  ;;  %v2024_v44 = vld [vmem:[%s1985_s25] sm:$0xf]  ;;  %v1896_v26 = vld [vmem:[%s2659_s1 + $0x58] sm:$0xff]  }
  0x1a   : > { %v2020_v40 = vrot.slane %v511_v30, 4  ;;  %v650_v41 = vrot.slane %v648_v32, 4  ;;  %v653_v42 = vrot.slane %v651_v33, 5  ;;  %v662_v43 = vshrl.u32 %v2005_v24, 16  ;;  %v2031_v49 = vld [vmem:[%s1985_s25 + $0x8] sm:$0xf]  ;;  %1766 = vmatprep.subr.bf16.mxu0 %v1896_v26 }
  0x1b   : > { %v2026_v45 = vrot.slane %v497_v35, 4  ;;  %v2028_v46 = vrot.slane %v483_v36, 4  ;;  %v469_v47 = vor.u32 %v468_v37, %v465_v31  ;;  %v659_v48 = vrot.slane %v657_v39, 5  ;;  %v2039_v55 = vld [vmem:[%s1985_s25 + $0x4] sm:$0x1]  ;;  %v1897_v33 = vld [vmem:[%s2659_s1 + $0x18] sm:$0xff]  }
  0x1c   : > { %2671 = vst [vmem:[#allocation4_spill] sm:$0xff] %v2020_v40  ;;  %v654_v51 = vor.u32 %v653_v42, %v650_v41  ;;  %v664_v52 = vrot.slane %v662_v43, 4  ;;  %v665_v53 = vshll.u32 %v2005_v24, 16  ;;  %v671_v54 = vshll.u32 %v2017_v38, 16  ;;  %v2049_v60 = vld [vmem:[%s1985_s25 + $0xc] sm:$0x1]  ;;  %1767 = vmatpush3.bf16.msra.mxu0 %v1897_v33 }
  0x1d   : > { %2672 = vst [vmem:[#allocation5_spill] sm:$0xff] %v2026_v45  ;;  %v2044_v57 = vrot.slane %v469_v47, 4  ;;  %v275_v61 = vshrl.u32 %v2024_v44, 16  ;;  %v278_v2 = vshll.u32 %v2024_v44, 16  ;;  %v2060_v3 = vld [vmem:[%s1985_s25 + $0xc] sm:$0x1] }
  0x1e   : > { %v655_v63 = vrot.slane %v654_v51, 4  ;;  %v667_v0 = vrot.slane %v665_v53, 5  ;;  %v673_v1 = vrot.slane %v671_v54, 5  ;;  %v284_v5 = vshll.u32 %v2039_v55, 16  ;;  %v2066_v8 = vld [vmem:[%s1985_s25 + $0x14] sm:$0x1] }
  0x1f   : > { %v277_v4 = vrot.slane %v275_v61, 4  ;;  %v289_v6 = vshrl.u32 %v2031_v49, 16  ;;  %v292_v7 = vshll.u32 %v2031_v49, 16  ;;  %v280_v10 = vrot.slane %v278_v2, 5  ;;  %v1633_v12 = vld [vmem:[%s1985_s25 + $0x8] sm:$0xe] }
  0x20   : > { %v668_v9 = vor.u32 %v667_v0, %v664_v52  ;;  %v298_v11 = vshll.u32 %v2049_v60, 16  ;;  %v1634_v13 = vld [vmem:[%s1985_s25 + $0x10] sm:$0xe]  ;;  %v660_v14 = vsel %vm2054_vm4, %v655_v63, %v659_v48  ;;  %v286_v15 = vrot.slane %v284_v5, 5  ;;  %v2088_v32 = vld [vmem:[%s1985_s25 + $0x14] sm:$0x1] }
  0x21   : > { %v291_v16 = vrot.slane %v289_v6, 4  ;;  %v294_v17 = vrot.slane %v292_v7, 5  ;;  %v2074_v19 = vld [vmem:[%s1985_s25 + $0x10] sm:$0xf]  ;;  %v281_v21 = vor.u32 %v280_v10, %v277_v4  ;;  %v1641_v28 = vrot.slane %v1633_v12, 9 }
  0x22   : > { %v669_v20 = vrot.slane %v668_v9, 4  ;;  %v300_v22 = vrot.slane %v298_v11, 5  ;;  %v600_v30 = vrot.slane %v2060_v3, 5  ;;  %v1642_v31 = vrot.slane %v1634_v13, 9  ;;  %v2097_v37 = vld [vmem:[%s1985_s25 + $0x18] sm:$0xf] }
  0x23   : > { %v295_v27 = vor.u32 %v294_v17, %v291_v16  ;;  %v282_v35 = vrot.slane %v281_v21, 4  ;;  %v604_v36 = vrot.slane %v2066_v8, 5  ;;  %v303_v39 = vshrl.u32 %v2074_v19, 16  ;;  %v1898_v41 = vld [vmem:[%s2659_s1 + $0xd0] sm:$0xff]   ;;  %v2106_v48 = vld [vmem:[%s1985_s25 + $0x1c] sm:$0x1] }
  0x24   : > { %v674_v34 = vsel %vm2054_vm4, %v669_v20, %v673_v1  ;;  %v601_v47 = vsel %vm2078_vm5, %v1641_v28, %v600_v30  ;;  %v306_v50 = vshll.u32 %v2074_v19, 16  ;;  %v312_v54 = vshll.u32 %v2088_v32, 16  ;;  %v2115_v56 = vld [vmem:[%s1985_s25 + $0x20] sm:$0xf]  ;;  %1804 = vmatprep.subr.bf16.mxu1 %v1898_v41  ;;  %v2122_v2 = vld [vmem:[%s1985_s25 + $0x28] sm:$0xf] }
  0x25   : > { %v1709_v42 = vcombine.low %v660_v14, %v674_v34  ;;  %v296_v43 = vrot.slane %v295_v27, 4  ;;  %v287_v51 = vsel %vm2054_vm4, %v282_v35, %v286_v15  ;;  %v605_v52 = vsel %vm2078_vm5, %v1642_v31, %v604_v36  ;;  %v1659_v4 = vld [vmem:[%s1985_s25 + $0x24] sm:$0x1]  ;;  %v1899_v10 = vld [vmem:[%s2659_s1 + $0x90] sm:$0xff]   ;;  %v2132_v13 = vld [vmem:[%s1985_s25 + $0x2c] sm:$0x1] }
  0x26   : > { %v305_v53 = vrot.slane %v303_v39, 4  ;;  %v1701_v63 = vcombine.low %v601_v47, %v605_v52  ;;  %v308_v0 = vrot.slane %v306_v50, 5  ;;  %v317_v1 = vshrl.u32 %v2097_v37, 16  ;;  %v1900_v16 = vld [vmem:[%s2659_s1 + $0x60] sm:$0xff]   ;;  %1805 = vmatpush3.bf16.msra.mxu1 %v1899_v10  ;;  %v2146_v39 = vld [vmem:[%s1985_s25 + $0x28] sm:$0xe] }
  0x27   : > { %959 = vrot.lane.b32.xlu1 %v1709_v42, %s1938_s5  ;;  %v301_v61 = vsel %vm2054_vm4, %v296_v43, %v300_v22  ;;  %v320_v7 = vshll.u32 %v2097_v37, 16  ;;  %v326_v9 = vshll.u32 %v2106_v48, 16  ;;  %v676_v14 = vshrl.u32 %v2115_v56, 16  ;;  %v1667_v26 = vld [vmem:[%s1985_s25 + $0x20] sm:$0xe]  ;;  %1768 = vmatprep.subr.bf16.mxu0 %v1900_v16 }
  0x28   : > { %v1685_v5 = vcombine.low %v287_v51, %v301_v61  ;;  %v309_v11 = vor.u32 %v308_v0, %v305_v53  ;;  %v319_v12 = vrot.slane %v317_v1, 4  ;;  %v679_v15 = vshll.u32 %v2115_v56, 16  ;;  %v1901_v41 = vld [vmem:[%s2659_s1 + $0x20] sm:$0xff]   ;;  %v1621_v61 = vld [vmem:[%s1985_s25 + $0x28] sm:$0xf] }
  0x29   : > { %v314_v17 = vrot.slane %v312_v54, 5  ;;  %v322_v20 = vrot.slane %v320_v7, 5  ;;  %v685_v21 = vshll.u32 %v1659_v4, 16  ;;  %v690_v22 = vshrl.u32 %v2122_v2, 16  ;;  %1769 = vmatpush3.bf16.msra.mxu0 %v1901_v41  ;;  %v1623_v41 = vld [vmem:[%s1985_s25 + $0x38] sm:$0xf] }
  0x2a   : > { %847 = vrot.lane.b32.xlu0 %v1685_v5, %s1938_s5  ;;  %v310_v27 = vrot.slane %v309_v11, 4  ;;  %v678_v28 = vrot.slane %v676_v14, 4  ;;  %v681_v30 = vrot.slane %v679_v15, 5  ;;  %v693_v31 = vshll.u32 %v2122_v2, 16  ;;  %v1622_v5 = vld [vmem:[%s1985_s25 + $0x30] sm:$0xf] }
  0x2b   : > { %919 = vrot.lane.b32.xlu1 %v1701_v63, %s1938_s5  ;;  %v323_v33 = vor.u32 %v322_v20, %v319_v12  ;;  %v328_v34 = vrot.slane %v326_v9, 5  ;;  %v692_v35 = vrot.slane %v690_v22, 4  ;;  %v699_v36 = vshll.u32 %v2132_v13, 16  ;;  %v1902_v9 = vld [vmem:[%s2659_s1 + $0xd8] sm:$0xff]   ;;  %v2166_v15 = vld [vmem:[%s1985_s25 + $0x24] sm:$0x1] }
  0x2c   : > { %v682_v42 = vor.u32 %v681_v30, %v678_v28  ;;  %v687_v43 = vrot.slane %v685_v21, 5  ;;  %v695_v47 = vrot.slane %v693_v31, 5  ;;  %v1675_v50 = vrot.slane %v1667_v26, 9  ;;  %v2163_v14 = vld [vmem:[%s1985_s25 + $0x1c] sm:$0x1]  ;;  %1806 = vmatprep.subr.bf16.mxu1 %v1902_v9 }
  0x2d   : > { %v315_v51 = vsel %vm2054_vm4, %v310_v27, %v314_v17  ;;  %v324_v52 = vrot.slane %v323_v33, 4  ;;  %v701_v53 = vrot.slane %v699_v36, 5  ;;  %v793_v54 = vrot.slane %v1659_v4, 5  ;;  %v1635_v22 = vld [vmem:[%s1985_s25 + $0x18] sm:$0xe] }
  0x2e   : > { %v683_v63 = vrot.slane %v682_v42, 4  ;;  %v696_v0 = vor.u32 %v695_v47, %v692_v35  ;;  %v1676_v1 = vrot.slane %v2146_v39, 9  ;;  %v519_v7 = vshrl.u32 %v1621_v61, 16  ;;  %v1636_v26 = vld [vmem:[%s1985_s25 + $0x20] sm:$0xe]  ;;  %v1903_v27 = vld [vmem:[%s2659_s1 + $0x98] sm:$0xff]  }
  0x2f   : > { %v329_v10 = vsel %vm2054_vm4, %v324_v52, %v328_v34  ;;  %v797_v11 = vrot.slane %v2132_v13, 5  ;;  %v522_v4 = vshll.u32 %v1621_v61, 16  ;;  %v533_v12 = vshrl.u32 %v1622_v5, 16  ;;  %v2180_v34 = vld [vmem:[%s1985_s25 + $0x20] sm:$0xf]  ;;  %1807 = vmatpush3.bf16.msra.mxu1 %v1903_v27 }
  0x30   : > { %v1686_v16 = vcombine.low %v315_v51, %v329_v10  ;;  %v688_v17 = vsel %vm2054_vm4, %v683_v63, %v687_v43  ;;  %v697_v20 = vrot.slane %v696_v0, 4  ;;  %v2172_v21 = vsel %vm2078_vm5, %v1675_v50, %v793_v54  ;;  %v2188_v43 = vld [vmem:[%s1985_s25 + $0x24] sm:$0x1]  ;;  %v2191_v54 = vld [vmem:[%s1985_s25 + $0x28] sm:$0xf] }
  0x31   : > { %v521_v28 = vrot.slane %v519_v7, 4  ;;  %v524_v30 = vrot.slane %v522_v4, 5  ;;  %v535_v31 = vrot.slane %v533_v12, 4  ;;  %v536_v33 = vshll.u32 %v1622_v5, 16  ;;  %v2205_v12 = vld [vmem:[%s1985_s25 + $0x30] sm:$0xf] }
  0x32   : > { %849 = vrot.lane.b32.xlu0 %v1686_v16, %s1938_s5  ;;  %v702_v35 = vsel %vm2054_vm4, %v697_v20, %v701_v53  ;;  %v1695_v36 = vcombine.low %v1621_v61, %v1622_v5  ;;  %v1643_v52 = vrot.slane %v1635_v22, 9  ;;  %v608_v63 = vrot.slane %v2163_v14, 5  ;;  %v2196_v61 = vld [vmem:[%s1985_s25 + $0x2c] sm:$0x1]  ;;  %v2217_v27 = vld [vmem:[%s1985_s25 + $0x38] sm:$0xf] }
  0x33   : > { %v1710_v47 = vcombine.low %v688_v17, %v702_v35  ;;  %v525_v50 = vor.u32 %v524_v30, %v521_v28  ;;  %v538_v51 = vrot.slane %v536_v33, 5  ;;  %v1644_v0 = vrot.slane %v1636_v26, 9  ;;  %v1904_v16 = vld [vmem:[%s2659_s1 + $0x68] sm:$0xff]   ;;  %v2220_v28 = vld [vmem:[%s1985_s25 + $0x34] sm:$0x1] }
  0x34   : > { %v612_v53 = vrot.slane %v2166_v15, 5  ;;  %v331_v5 = vshrl.u32 %v2180_v34, 16  ;;  %v334_v10 = vshll.u32 %v2180_v34, 16  ;;  %v340_v4 = vshll.u32 %v2188_v43, 16  ;;  %2678 = vst [vmem:[#allocation7_spill] sm:$0xff] %v2220_v28  ;;  %1770 = vmatprep.subr.bf16.mxu0 %v1904_v16 }
  0x35   : > { %961 = vrot.lane.b32.xlu1 %v1710_v47, %s1938_s5  ;;  %v2200_v7 = vrot.slane %v525_v50, 4  ;;  %v539_v9 = vor.u32 %v538_v51, %v535_v31  ;;  %v609_v17 = vsel %vm2078_vm5, %v1643_v52, %v608_v63  ;;  %v345_v26 = vshrl.u32 %v2191_v54, 16  ;;  %v1637_v42 = vld [vmem:[%s1985_s25 + $0x28] sm:$0xe]  ;;  %v2259_v6 = vld [vmem:[%s1985_s25 + $0x34] sm:$0x1] }
  0x36   : > { %891 = vrot.lane.b32.xlu0 %v1695_v36, %s1938_s5  ;;  %v613_v20 = vsel %vm2078_vm5, %v1644_v0, %v612_v53  ;;  %v333_v22 = vrot.slane %v331_v5, 4  ;;  %v336_v33 = vrot.slane %v334_v10, 5  ;;  %v342_v35 = vrot.slane %v340_v4, 5  ;;  %v1905_v36 = vld [vmem:[%s2659_s1 + $0x28] sm:$0xff]   ;;  %v2232_v0 = vld [vmem:[%s1985_s25 + $0x3c] sm:$0x1] }
  0x37   : > { %2677 = vst [vmem:[#allocation6_spill] sm:$0xff] %v2200_v7  ;;  %v2222_v30 = vrot.slane %v539_v9, 4  ;;  %v1702_v31 = vcombine.low %v609_v17, %v613_v20  ;;  %v347_v47 = vrot.slane %v345_v26, 4  ;;  %v348_v50 = vshll.u32 %v2191_v54, 16  ;;  %2680 = vst [vmem:[#allocation9_spill] sm:$0xff] %v2232_v0  ;;  %1771 = vmatpush3.bf16.msra.mxu0 %v1905_v36  ;;  %v1906_v10 = vld [vmem:[%s2659_s1 + $0xe0] sm:$0xff]  }
  0x38   : > { %v354_v51 = vshll.u32 %v2196_v61, 16  ;;  %v704_v52 = vshrl.u32 %v2205_v12, 16  ;;  %v337_v63 = vor.u32 %v336_v33, %v333_v22  ;;  %v707_v53 = vshll.u32 %v2205_v12, 16  ;;  %1808 = vmatprep.subr.bf16.mxu1 %v1906_v10  ;;  %2682 = vst [vmem:[#allocation11_spill] sm:$0xff] %v2259_v6  ;;  %v1671_v38 = vld [vmem:[%s1985_s25 + $0x40] sm:$0xe] }
  0x39   : > { %2679 = vst [vmem:[#allocation8_spill] sm:$0xff] %v2222_v30  ;;  %921 = vrot.lane.b32.xlu1 %v1702_v31, %s1938_s5  ;;  %v713_v5 = vshll.u32 %v2220_v28, 16  ;;  %v718_v9 = vshrl.u32 %v2217_v27, 16  ;;  %v350_v4 = vrot.slane %v348_v50, 5  ;;  %v721_v20 = vshll.u32 %v2217_v27, 16  ;;  %v1907_v50 = vld [vmem:[%s2659_s1 + $0xa0] sm:$0xff]  }
  0x3a   : > { %v356_v16 = vrot.slane %v354_v51, 5  ;;  %v706_v17 = vrot.slane %v704_v52, 4  ;;  %v338_v22 = vrot.slane %v337_v63, 4  ;;  %v709_v26 = vrot.slane %v707_v53, 5  ;;  %1809 = vmatpush3.bf16.msra.mxu1 %v1907_v50  ;;  %v2285_v28 = vld [vmem:[%s1985_s25 + $0x38] sm:$0xf] }
  0x3b   : > { %v715_v31 = vrot.slane %v713_v5, 5  ;;  %v720_v33 = vrot.slane %v718_v9, 4  ;;  %v351_v59 = vor.u32 %v350_v4, %v347_v47  ;;  %v723_v58 = vrot.slane %v721_v20, 5  ;;  %v1624_v47 = vld [vmem:[%s1985_s25 + $0x40] sm:$0xf] }
  0x3c   : > { %v727_v36 = vshll.u32 %v2232_v0, 16  ;;  %v343_v51 = vsel %vm2054_vm4, %v338_v22, %v342_v35  ;;  %v710_v52 = vor.u32 %v709_v26, %v706_v17  ;;  %v547_v53 = vshrl.u32 %v1623_v41, 16  ;;  %v2252_v20 = vld [vmem:[%s1985_s25 + $0x2c] sm:$0x1]  ;;  %v1908_v35 = vld [vmem:[%s2659_s1 + $0x70] sm:$0xff]  }
  0x3d   : > { %v352_v5 = vrot.slane %v351_v59, 4  ;;  %v724_v9 = vor.u32 %v723_v58, %v720_v33  ;;  %v550_v4 = vshll.u32 %v1623_v41, 16  ;;  %2681 = vst [vmem:[#allocation10_spill] sm:$0xff] %v2252_v20  ;;  %v561_v26 = vshrl.u32 %v1624_v47, 16  ;;  %v1638_v59 = vld [vmem:[%s1985_s25 + $0x30] sm:$0xe]  ;;  %1772 = vmatprep.subr.bf16.mxu0 %v1908_v35 }
  0x3e   : > { %v729_v10 = vrot.slane %v727_v36, 5  ;;  %v711_v17 = vrot.slane %v710_v52, 4  ;;  %v549_v22 = vrot.slane %v547_v53, 4  ;;  %v564_v63 = vshll.u32 %v1624_v47, 16  ;;  %v2263_v58 = vld [vmem:[%s1985_s25 + $0x30] sm:$0xf] }
  0x3f   : > { %v2271_v33 = vsel %vm2078_vm5, %v1676_v1, %v797_v11  ;;  %v357_v36 = vsel %vm2054_vm4, %v352_v5, %v356_v16  ;;  %v725_v50 = vrot.slane %v724_v9, 4  ;;  %v552_v52 = vrot.slane %v550_v4, 5  ;;  %v2276_v53 = vld [vmem:[%s1985_s25 + $0x34] sm:$0x1]  ;;  %v2297_v35 = vld [vmem:[%s1985_s25 + $0x40] sm:$0xf] }
  0x40   : > { %v1687_v25 = vcombine.low %v343_v51, %v357_v36  ;;  %v716_v13 = vsel %vm2054_vm4, %v711_v17, %v715_v31  ;;  %v2280_v0 = vrot.slane %v561_v26, 4  ;;  %v2282_v39 = vrot.slane %v564_v63, 5  ;;  %v2292_v51 = vld [vmem:[%s1985_s25 + $0x3c] sm:$0x1]  ;;  %v2304_v36 = vld [vmem:[%s1985_s25 + $0x48] sm:$0xf] }
  0x41   : > { %v730_v1 = vsel %vm2054_vm4, %v725_v50, %v729_v10  ;;  %v553_v11 = vor.u32 %v552_v52, %v549_v22  ;;  %2683 = vst [vmem:[#allocation12_spill] sm:$0xff] %v2292_v51  ;;  %v1696_v9 = vcombine.low %v1623_v41, %v1624_v47  ;;  %v1645_v63 = vrot.slane %v1637_v42, 9  ;;  %v2307_v50 = vld [vmem:[%s1985_s25 + $0x44] sm:$0x1]  ;;  %v1672_v30 = vld [vmem:[%s1985_s25 + $0x48] sm:$0xe] }
  0x42   : > { %851 = vrot.lane.b32.xlu0 %v1687_v25, %s1938_s5  ;;  %v1711_v31 = vcombine.low %v716_v13, %v730_v1  ;;  %v616_v4 = vrot.slane %v2252_v20, 5  ;;  %v1646_v17 = vrot.slane %v1638_v59, 9  ;;  %v620_v22 = vrot.slane %v2259_v6, 5  ;;  %v1909_v59 = vld [vmem:[%s2659_s1 + $0x30] sm:$0xff]   ;;  %v1639_v7 = vld [vmem:[%s1985_s25 + $0x38] sm:$0xe] }
  0x43   : > { %v359_v26 = vshrl.u32 %v2263_v58, 16  ;;  %v2310_v25 = vrot.slane %v553_v11, 4  ;;  %v362_v42 = vshll.u32 %v2263_v58, 16  ;;  %v368_v47 = vshll.u32 %v2276_v53, 16  ;;  %1773 = vmatpush3.bf16.msra.mxu0 %v1909_v59  ;;  %v1912_v59 = vld [vmem:[%s2659_s1 + $0x78] sm:$0xff]  }
  0x44   : > { %963 = vrot.lane.b32.xlu1 %v1711_v31, %s1938_s5  ;;  %v617_v41 = vsel %vm2078_vm5, %v1645_v63, %v616_v4  ;;  %v621_v52 = vsel %vm2078_vm5, %v1646_v17, %v620_v22  ;;  %v373_v1 = vshrl.u32 %v2285_v28, 16  ;;  %v376_v11 = vshll.u32 %v2285_v28, 16  ;;  %v1664_v31 = vld [vmem:[%s1985_s25 + $0x4c] sm:$0x1]  ;;  %1774 = vmatprep.subr.bf16.mxu0 %v1912_v59 }
  0x45   : > { %2684 = vst [vmem:[#allocation13_spill] sm:$0xff] %v2310_v25  ;;  %v361_v13 = vrot.slane %v359_v26, 4  ;;  %v1910_v63 = vld [vmem:[%s2659_s1 + $0xe8] sm:$0xff]   ;;  %v1703_v4 = vcombine.low %v617_v41, %v621_v52  ;;  %v364_v5 = vrot.slane %v362_v42, 5  ;;  %v370_v16 = vrot.slane %v368_v47, 5 }
  0x46   : > { %893 = vrot.lane.b32.xlu0 %v1696_v9, %s1938_s5  ;;  %v382_v10 = vshll.u32 %v2292_v51, 16  ;;  %v1911_v17 = vld [vmem:[%s2659_s1 + $0xa8] sm:$0xff]   ;;  %v375_v22 = vrot.slane %v373_v1, 4  ;;  %v378_v26 = vrot.slane %v376_v11, 5  ;;  %v732_v29 = vshrl.u32 %v2297_v35, 16  ;;  %1810 = vmatprep.subr.bf16.mxu1 %v1910_v63  ;;  %v1914_v51 = vld [vmem:[%s2659_s1 + $0xf0] sm:$0xff]  }
  0x47   : > { %v735_v25 = vshll.u32 %v2297_v35, 16  ;;  %v365_v9 = vor.u32 %v364_v5, %v361_v13  ;;  %v741_v42 = vshll.u32 %v2307_v50, 16  ;;  %v746_v47 = vshrl.u32 %v2304_v36, 16  ;;  %1811 = vmatpush3.bf16.msra.mxu1 %v1911_v17  ;;  %v1913_v5 = vld [vmem:[%s2659_s1 + $0x38] sm:$0xff]  }
  0x48   : > { %923 = vrot.lane.b32.xlu1 %v1703_v4, %s1938_s5  ;;  %v384_v41 = vrot.slane %v382_v10, 5  ;;  %v379_v52 = vor.u32 %v378_v26, %v375_v22  ;;  %v734_v1 = vrot.slane %v732_v29, 4  ;;  %v749_v63 = vshll.u32 %v2304_v36, 16  ;;  %v2348_v26 = vld [vmem:[%s1985_s25 + $0x3c] sm:$0x1]  ;;  %1775 = vmatpush3.bf16.msra.mxu0 %v1913_v5 }
  0x49   : > { %v737_v11 = vrot.slane %v735_v25, 5  ;;  %v366_v10 = vrot.slane %v365_v9, 4  ;;  %v743_v13 = vrot.slane %v741_v42, 5  ;;  %v748_v4 = vrot.slane %v746_v47, 4  ;;  %v2351_v29 = vld [vmem:[%s1985_s25 + $0x44] sm:$0x1]  ;;  %1812 = vmatprep.subr.bf16.mxu1 %v1914_v51 }
  0x4a   : > { %v755_v17 = vshll.u32 %v1664_v31, 16  ;;  %v380_v6 = vrot.slane %v379_v52, 4  ;;  %v751_v40 = vrot.slane %v749_v63, 5  ;;  %v1679_v22 = vrot.slane %v1671_v38, 9  ;;  %v1640_v25 = vld [vmem:[%s1985_s25 + $0x40] sm:$0xe] }
  0x4b   : > { %v738_v20 = vor.u32 %v737_v11, %v734_v1  ;;  %v371_v9 = vsel %vm2054_vm4, %v366_v10, %v370_v16  ;;  %v809_v47 = vrot.slane %v2307_v50, 5  ;;  %v1680_v59 = vrot.slane %v1672_v30, 9  ;;  %v1915_v38 = vld [vmem:[%s2659_s1 + $0xb0] sm:$0xff]  }
  0x4c   : > { %v757_v42 = vrot.slane %v755_v17, 5  ;;  %v385_v52 = vsel %vm2054_vm4, %v380_v6, %v384_v41  ;;  %v752_v11 = vor.u32 %v751_v40, %v748_v4  ;;  %v813_v63 = vrot.slane %v1664_v31, 5  ;;  %1813 = vmatpush3.bf16.msra.mxu1 %v1915_v38  ;;  %v2700_v38 = vld [vmem:[#allocation2_spill] sm:$0xff] }
  0x4d   : > { %v739_v1 = vrot.slane %v738_v20, 4  ;;  %v2685_v5 = vor.u32 %v2282_v39, %v2280_v0  ;;  %v1688_v16 = vcombine.low %v371_v9, %v385_v52  ;;  %v2372_v30 = vsel %vm2078_vm5, %v1679_v22, %v809_v47 }
  0x4e   : > { %v556_v50 = vshll.u32 %v2348_v26, 16  ;;  %v753_v20 = vrot.slane %v752_v11, 4  ;;  %v2379_v40 = vsel %vm2078_vm5, %v1680_v59, %v813_v63  ;;  %v1647_v51 = vrot.slane %v1639_v7, 9  ;;  %v386_v11 = vld [vmem:[%s1985_s25] sm:$0xe] }
  0x4f   : > { %v2368_v45 = vrot.slane %v2685_v5, 4  ;;  %v744_v6 = vsel %vm2054_vm4, %v739_v1, %v743_v13  ;;  %853 = vrot.lane.b32.xlu0 %v1688_v16, %s1938_s5  ;;  %v624_v0 = vrot.slane %v2348_v26, 5  ;;  %v1648_v39 = vrot.slane %v1640_v25, 9  ;;  %v387_v63 = vld [vmem:[%s1985_s25 + $0x8] sm:$0xe]  ;;  %v2698_v1 = vld [vmem:[#allocation8_spill] sm:$0xff] }
  0x50   : > { %v628_v31 = vrot.slane %v2351_v29, 5  ;;  %v415_v41 = vrot.slane %v2039_v55, 5  ;;  %v758_v10 = vsel %vm2054_vm4, %v753_v20, %v757_v42  ;;  %v1681_v13 = vcombine.low %v2024_v44, %v2031_v49  ;;  %v2419_v20 = vld [vmem:[%s2659_s1 + $0x100] sm:$0xff]   ;;  %v1927_v44 = vld [vmem:[%s2659_s1 + $0x118] sm:$0xff]  }
  0x51   : > { %v1705_v4 = vcombine.low %v1998_v18, %v2005_v24  ;;  %v1682_v7 = vcombine.low %v2074_v19, %v2097_v37  ;;  %v1712_v17 = vcombine.low %v744_v6, %v758_v10  ;;  %v625_v22 = vsel %vm2078_vm5, %v1647_v51, %v624_v0  ;;  %1848 = vmatprep.subr.bf16.mxu0 %v2419_v20  ;;  %v388_v10 = vld [vmem:[%s1985_s25 + $0x10] sm:$0xe] }
  0x52   : > { %v629_v55 = vsel %vm2078_vm5, %v1648_v39, %v628_v31  ;;  %v1706_v25 = vcombine.low %v2115_v56, %v2122_v2  ;;  %v1683_v42 = vcombine.low %v2180_v34, %v2191_v54  ;;  %v1707_v47 = vcombine.low %v2205_v12, %v2217_v27  ;;  %v1924_v18 = vld [vmem:[%s2659_s1 + $0x110] sm:$0xff]  }
  0x53   : > { %v1704_v9 = vcombine.low %v625_v22, %v629_v55  ;;  %v1684_v59 = vcombine.low %v2263_v58, %v2285_v28  ;;  %965 = vrot.lane.b32.xlu0 %v1712_v17, %s1938_s5  ;;  %v1609_v5 = vrot.slane %v386_v11, 9  ;;  %v419_v16 = vrot.slane %v2049_v60, 5  ;;  %v1918_v60 = vld [vmem:[%s2659_s1 + $0xf8] sm:$0xff]  }
  0x54   : > { %v1610_v6 = vrot.slane %v387_v63, 9  ;;  %v423_v39 = vrot.slane %v2088_v32, 5  ;;  %v427_v17 = vrot.slane %v2106_v48, 5  ;;  %v1919_v22 = vld [vmem:[%s2659_s1 + $0xb8] sm:$0xff]   ;;  %1814 = vmatprep.subr.bf16.mxu1 %v1918_v60  ;;  %v1611_v55 = vrot.slane %v388_v10, 9 }
  0x55   : > { %925 = vrot.lane.b32.xlu1 %v1704_v9, %s1938_s5  ;;  %v2423_v51 = vsel %vm2078_vm5, %v1609_v5, %v415_v41  ;;  %v389_v41 = vld [vmem:[%s1985_s25 + $0x18] sm:$0xe]  ;;  %1815 = vmatpush3.bf16.msra.mxu1 %v1919_v22  ;;  %v2686_v11 = vshll.u32 %v2060_v3, 16  ;;  %v2687_v63 = vshll.u32 %v2066_v8, 16  ;;  %v390_v60 = vld [vmem:[%s1985_s25 + $0x20] sm:$0xe]  ;;  %v2709_v28 = vcombine.low %v2172_v21, %v2271_v33 }
  0x56   : > { %v2427_v0 = vsel %vm2078_vm5, %v1610_v6, %v419_v16  ;;  %v1612_v9 = vrot.slane %v389_v41, 9  ;;  %v570_v16 = vshll.u32 %v2351_v29, 16  ;;  %v2449_v48 = vsel %vm2078_vm5, %v1611_v55, %v423_v39  ;;  %1864 = vmatprep.subr.bf16.mxu1 %v2419_v20  ;;  %v391_v3 = vld [vmem:[%s1985_s25 + $0x28] sm:$0xe] }
  0x57   : > { %v1689_v31 = vcombine.low %v2423_v51, %v2427_v0  ;;  %v474_v32 = vrot.slane %v2686_v11, 5  ;;  %v488_v5 = vrot.slane %v2687_v63, 5  ;;  %v431_v10 = vrot.slane %v2188_v43, 5  ;;  %v392_v11 = vld [vmem:[%s1985_s25 + $0x30] sm:$0xe] }
  0x58   : > { %v2453_v6 = vsel %vm2078_vm5, %v1612_v9, %v427_v17  ;;  %v1613_v41 = vrot.slane %v390_v60, 9  ;;  %v1614_v22 = vrot.slane %v391_v3, 9  ;;  %v435_v55 = vrot.slane %v2196_v61, 5  ;;  %v2690_v61 = vld [vmem:[#allocation5_spill] sm:$0xff]  ;;  %v2691_v3 = vld [vmem:[#allocation12_spill] sm:$0xff] }
  0x59   : > { %v1690_v8 = vcombine.low %v2449_v48, %v2453_v6  ;;  %v475_v29 = vsel %vm2054_vm4, %v2044_v57, %v474_v32  ;;  %v489_v39 = vsel %vm2054_vm4, %v2028_v46, %v488_v5  ;;  %v2688_v9 = vshll.u32 %v2163_v14, 16  ;;  %v393_v48 = vld [vmem:[%s1985_s25 + $0x38] sm:$0xe] }
  0x5a   : > { %v1697_v17 = vcombine.low %v475_v29, %v489_v39  ;;  %v2473_v63 = vsel %vm2078_vm5, %v1613_v41, %v431_v10  ;;  %v2689_v57 = vshll.u32 %v2166_v15, 16  ;;  %v1615_v46 = vrot.slane %v392_v11, 9  ;;  %v2692_v29 = vld [vmem:[#allocation4_spill] sm:$0xff]  ;;  %v2693_v41 = vld [vmem:[#allocation10_spill] sm:$0xff]  ;;  %v1666_v11 = vld [vmem:[%s1985_s25 + $0x18] sm:$0xe] }
  0x5b   : > { %v502_v43 = vrot.slane %v2688_v9, 5  ;;  %v439_v5 = vrot.slane %v2276_v53, 5  ;;  %v2481_v14 = vsel %vm2078_vm5, %v1614_v22, %v435_v55  ;;  %v1616_v60 = vrot.slane %v393_v48, 9  ;;  %v1665_v9 = vld [vmem:[%s1985_s25 + $0x10] sm:$0xe]  ;;  %v2695_v48 = vld [vmem:[#allocation11_spill] sm:$0xff] }
  0x5c   : > { %v516_v32 = vrot.slane %v2689_v57, 5  ;;  %v443_v10 = vrot.slane %v2691_v3, 5  ;;  %v1691_v15 = vcombine.low %v2473_v63, %v2481_v14  ;;  %v2694_v22 = vshll.u32 %v2693_v41, 16  ;;  %v2697_v41 = vld [vmem:[#allocation6_spill] sm:$0xff] }
  0x5d   : > { %v503_v6 = vsel %vm2054_vm4, %v2690_v61, %v502_v43  ;;  %v2494_v53 = vsel %vm2078_vm5, %v1615_v46, %v439_v5  ;;  %v2696_v61 = vshll.u32 %v2695_v48, 16  ;;  %v1670_v46 = vld [vmem:[%s1985_s25 + $0x38] sm:$0xe]  ;;  %v2710_v58 = vcombine.low %v2372_v30, %v2379_v40 }
  0x5e   : > { %v517_v39 = vsel %vm2054_vm4, %v2692_v29, %v516_v32  ;;  %v530_v55 = vrot.slane %v2694_v22, 5  ;;  %v2504_v57 = vsel %vm2078_vm5, %v1616_v60, %v443_v10  ;;  %v558_v32 = vrot.slane %v556_v50, 5  ;;  %v1669_v29 = vld [vmem:[%s1985_s25 + $0x30] sm:$0xe]  ;;  %v2699_v10 = vld [vmem:[#allocation13_spill] sm:$0xff] }
  0x5f   : > { %v2500_v43 = vcombine.low %v503_v6, %v517_v39  ;;  %v544_v3 = vrot.slane %v2696_v61, 5  ;;  %v1692_v5 = vcombine.low %v2494_v53, %v2504_v57  ;;  %v572_v39 = vrot.slane %v570_v16, 5 }
  0x60   : > { %v531_v6 = vsel %vm2054_vm4, %v2697_v41, %v530_v55  ;;  %v1673_v22 = vrot.slane %v1665_v9, 9  ;;  %v559_v26 = vsel %vm2054_vm4, %v2699_v10, %v558_v32  ;;  %v1674_v50 = vrot.slane %v1666_v11, 9  ;;  %v2704_v32 = vld [vmem:[#allocation7_spill] sm:$0xff] }
  0x61   : > { %v545_v60 = vsel %vm2054_vm4, %v2698_v1, %v544_v3  ;;  %v1677_v48 = vrot.slane %v1669_v29, 9  ;;  %v573_v52 = vsel %vm2054_vm4, %v2368_v45, %v572_v39  ;;  %v2701_v55 = vrot.slane %v2700_v38, 5  ;;  %v2702_v3 = vld [vmem:[#allocation3_spill] sm:$0xff]  ;;  %v2706_v38 = vld [vmem:[#allocation9_spill] sm:$0xff] }
  0x62   : > { %v2523_v61 = vcombine.low %v531_v6, %v545_v60  ;;  %v1678_v9 = vrot.slane %v1670_v46, 9  ;;  %v2534_v1 = vcombine.low %v559_v26, %v573_v52  ;;  %v2703_v41 = vrot.slane %v2702_v3, 5 }
  0x63   : > { %v2532_v16 = vsel %vm2078_vm5, %v1673_v22, %v2701_v55  ;;  %v2705_v29 = vrot.slane %v2704_v32, 5  ;;  %v2707_v6 = vrot.slane %v2706_v38, 5 }
  0x64   : > { %v2540_v11 = vsel %vm2078_vm5, %v1674_v50, %v2703_v41 }
  0x65   : > { %v2546_v45 = vsel %vm2078_vm5, %v1677_v48, %v2705_v29  ;;  %v1713_v62 = vcombine.low %v2532_v16, %v2540_v11  ;;  %v2554_v52 = vsel %vm2078_vm5, %v1678_v9, %v2707_v6  ;;  %v1921_v48 = vld [vmem:[%s2659_s1 + $0x108] sm:$0xff]  }
  0x66   : > { %v1715_v46 = vcombine.low %v2546_v45, %v2554_v52 }
  0x88   : > { %v890_v60 = vpop.permute.xlu1 %889 }
  0x89   : > { %v888_v39 = vpop.permute.xlu0 %887  ;;  %v1002_v50 = vsel %vm979_vm6, %v1690_v8, %v890_v60 }
  0x8a   : > { %v998_v22 = vsel %vm979_vm6, %v1689_v31, %v888_v39 }
  0x8b   : > { %1304 = vmatprep.mubr.bf16.mxu0 %v998_v22 }
  0x99   : > { %v960_v10 = vpop.permute.xlu1 %959 }
  0x9a   : > { %v1030_v23 = vsel %vm979_vm6, %v1705_v4, %v960_v10 }
  0x9b   : > { %1369 = vmatprep.mubr.bf16.mxu1 %v1030_v23 }
  0x9c   : > { %v848_v26 = vpop.permute.xlu0 %847 }
  0x9d   : > { %v982_v51 = vsel %vm979_vm6, %v1681_v13, %v848_v26  ;;  %v920_v0 = vpop.permute.xlu1 %919 }
  0x9e   : > { %1305 = vmatmul.mubr.bf16.vlgmr.msra.gmra.mrb[0].mxu0 %v982_v51  ;;  %v1014_v31 = vsel %vm979_vm6, %v1697_v17, %v920_v0 }
  0x9f   : > { %1849 = vmatpush3.bf16.msra.mxu0 %v2419_v20  ;;  %1312 = vmatprep.mubr.bf16.mxu0 %v1002_v50 }
  0xa0   : > { %1370 = vmatmul.mubr.bf16.vlgmr.msra.gmra.mrb[0].mxu1 %v1014_v31  ;;  %1850 = vmatprep.subr.bf16.mxu0 %v1921_v48 }
  0xa1   : > { %1868 = vmatpush3.bf16.msra.mxu1 %v2419_v20 }
  0xa2   : > { %1865 = vmatprep.subr.bf16.mxu1 %v1921_v48 }
  0xa3   : > { %1851 = vmatpush3.bf16.msra.mxu0 %v1921_v48 }
  0xa4   : > { %1852 = vmatprep.subr.bf16.mxu0 %v1924_v18  ;;  %v850_v24 = vpop.permute.xlu0 %849 }
  0xa5   : > { %1869 = vmatpush3.bf16.msra.mxu1 %v1921_v48  ;;  %v986_v49 = vsel %vm979_vm6, %v1682_v7, %v850_v24 }
  0xa6   : > { %1866 = vmatprep.subr.bf16.mxu1 %v1924_v18  ;;  %1313 = vmatmul.mubr.bf16.gmra.mrb[4].mxu0 %v986_v49 }
  0xa7   : > { %v962_v13 = vpop.permute.xlu1 %961  ;;  %1853 = vmatpush3.bf16.msra.mxu0 %v1924_v18 }
  0xa8   : > { %v892_v4 = vpop.permute.xlu0 %891  ;;  %v1034_v20 = vsel %vm979_vm6, %v1706_v25, %v962_v13  ;;  %1854 = vmatprep.subr.bf16.mxu0 %v1927_v44 }
  0xa9   : > { %1870 = vmatpush3.bf16.msra.mxu1 %v1924_v18  ;;  %1377 = vmatprep.mubr.bf16.mxu1 %v1034_v20  ;;  %v1006_v19 = vsel %vm979_vm6, %v1691_v15, %v892_v4 }
  0xaa   : > { %1867 = vmatprep.subr.bf16.mxu1 %v1927_v44  ;;  %1320 = vmatprep.mubr.bf16.mxu0 %v1006_v19 }
  0xab   : > { %v922_v37 = vpop.permute.xlu1 %921  ;;  %1855 = vmatpush3.bf16.msra.mxu0 %v1927_v44 }
  0xac   : > { %v1018_v7 = vsel %vm979_vm6, %v2500_v43, %v922_v37 }
  0xad   : > { %1871 = vmatpush3.bf16.msra.mxu1 %v1927_v44 }
  0xae   : > { %1378 = vmatmul.mubr.bf16.gmra.mrb[4].mxu1 %v1018_v7 }
  0xb4   : > { %v852_v56 = vpop.permute.xlu0 %851 }
  0xb5   : > { %v990_v2 = vsel %vm979_vm6, %v1683_v42, %v852_v56 }
  0xb6   : > { %v964_v25 = vpop.permute.xlu1 %963  ;;  %1321 = vmatmul.mubr.bf16.gmra.mrb[8].mxu0 %v990_v2 }
  0xb7   : > { %v1038_v8 = vsel %vm979_vm6, %v1707_v47, %v964_v25  ;;  %v2708_v47 = vcombine.low %v2297_v35, %v2304_v36 }
  0xb8   : > { %v894_v17 = vpop.permute.xlu0 %893  ;;  %1385 = vmatprep.mubr.bf16.mxu1 %v1038_v8 }
  0xb9   : > { %v1010_v63 = vsel %vm979_vm6, %v1692_v5, %v894_v17 }
  0xba   : > { %v924_v14 = vpop.permute.xlu1 %923  ;;  %1328 = vmatprep.mubr.bf16.mxu0 %v1010_v63 }
  0xbb   : > { %v1022_v34 = vsel %vm979_vm6, %v2523_v61, %v924_v14 }
  0xbc   : > { %1386 = vmatmul.mubr.bf16.gmra.mrb[8].mxu1 %v1022_v34 }
  0xc1   : > { %v854_v54 = vpop.permute.xlu0 %853 }
  0xc2   : > { %v994_v12 = vsel %vm979_vm6, %v1684_v59, %v854_v54 }
  0xc3   : > { %1329 = vmatmul.mubr.bf16.gmra.mrb[12].mxu0 %v994_v12 }
  0xc4   : > { %1856 = vmatprep.mubr.msk.bf16.mxu0 %vm979_vm6, %v1713_v62 }
  0xc5   : > { %v966_v27 = vpop.permute.xlu0 %965 }
  0xc6   : > { %v1042_v15 = vsel %vm979_vm6, %v2708_v47, %v966_v27 }
  0xc7   : > { %v926_v42 = vpop.permute.xlu1 %925  ;;  %1393 = vmatprep.mubr.bf16.mxu1 %v1042_v15 }
  0xc8   : > { %v1026_v53 = vsel %vm979_vm6, %v2534_v1, %v926_v42 }
  0xc9   : > { %1394 = vmatmul.mubr.bf16.gmra.mrb[12].mxu1 %v1026_v53 }
  0xca   : > { %1860 = vmatprep.mubr.msk.bf16.mxu1 %vm979_vm6, %v1715_v46 }
  0xcb   : > { %1857 = vmatmul.mubr.msk.bf16.vlgmr.msra.gmra.mrb[16].mxu0 %vm979_vm6, %v2709_v28 }
  0xd1   : > { %1861 = vmatmul.mubr.msk.bf16.vlgmr.msra.gmra.mrb[16].mxu1 %vm979_vm6, %v2710_v58 }
 0x171   : > { %v1776_v35 = vpop.f32.mrb[0].mxu0 }
 0x172   : > { %v1777_v36 = vpop.f32.mrb[1].mxu0 }
 0x173   : > { %v1778_v59 = vadd.f32 %v1777_v36, %v1776_v35  ;;  %v1779_v43 = vpop.f32.mrb[2].mxu0  ;;  %v1816_v57 = vpop.f32.mrb[0].mxu1 }
 0x174   : > { %v1780_v5 = vpop.f32.mrb[3].mxu0  ;;  %v1817_v61 = vpop.f32.mrb[1].mxu1 }
 0x175   : > { %v1781_v55 = vadd.f32 %v1780_v5, %v1779_v43  ;;  %v1818_v16 = vadd.f32 %v1817_v61, %v1816_v57  ;;  %v1819_v9 = vpop.f32.mrb[2].mxu1 }
 0x176   : > { %v1820_v1 = vpop.f32.mrb[3].mxu1 }
 0x177   : > { %v1821_v3 = vadd.f32 %v1820_v1, %v1819_v9  ;;  %v1372_v21 = vadd.f32 %v1818_v16, %v1778_v59 }
 0x179   : > { %v1375_v33 = vadd.f32 %v1821_v3, %v1781_v55  ;;  %v1782_v41 = vpop.f32.mrb[4].mxu0 }
 0x17a   : > { %v1783_v11 = vpop.f32.mrb[5].mxu0 }
 0x17b   : > { %v1784_v32 = vadd.f32 %v1783_v11, %v1782_v41  ;;  %v1785_v30 = vpop.f32.mrb[6].mxu0 }
 0x17c   : > { %v1786_v40 = vpop.f32.mrb[7].mxu0 }
 0x17d   : > { %v1787_v29 = vadd.f32 %v1786_v40, %v1785_v30 }
 0x181   : > { %v1822_v45 = vpop.f32.mrb[4].mxu1 }
 0x182   : > { %v1823_v62 = vpop.f32.mrb[5].mxu1 }
 0x183   : > { %v1824_v38 = vadd.f32 %v1823_v62, %v1822_v45  ;;  %v1825_v6 = vpop.f32.mrb[6].mxu1 }
 0x184   : > { %v1826_v52 = vpop.f32.mrb[7].mxu1 }
 0x185   : > { %v1827_v46 = vadd.f32 %v1826_v52, %v1825_v6  ;;  %v1380_v39 = vadd.f32 %v1824_v38, %v1784_v32 }
 0x187   : > { %v1383_v22 = vadd.f32 %v1827_v46, %v1787_v29 }
 0x189   : > { %v1788_v60 = vpop.f32.mrb[8].mxu0 }
 0x18a   : > { %v1789_v10 = vpop.f32.mrb[9].mxu0 }
 0x18b   : > { %v1790_v23 = vadd.f32 %v1789_v10, %v1788_v60  ;;  %v1791_v26 = vpop.f32.mrb[10].mxu0 }
 0x18c   : > { %v1792_v50 = vpop.f32.mrb[11].mxu0 }
 0x18d   : > { %v1793_v48 = vadd.f32 %v1792_v50, %v1791_v26 }
 0x18f   : > { %v1828_v51 = vpop.f32.mrb[8].mxu1 }
 0x190   : > { %v1829_v0 = vpop.f32.mrb[9].mxu1 }
 0x191   : > { %v1830_v31 = vadd.f32 %v1829_v0, %v1828_v51  ;;  %v1831_v18 = vpop.f32.mrb[10].mxu1 }
 0x192   : > { %v1832_v24 = vpop.f32.mrb[11].mxu1 }
 0x193   : > { %v1833_v44 = vadd.f32 %v1832_v24, %v1831_v18  ;;  %v1388_v49 = vadd.f32 %v1830_v31, %v1790_v23 }
 0x195   : > { %v1391_v13 = vadd.f32 %v1833_v44, %v1793_v48 }
 0x196   : > { %v1794_v4 = vpop.f32.mrb[12].mxu0 }
 0x197   : > { %v1795_v20 = vpop.f32.mrb[13].mxu0 }
 0x198   : > { %v1796_v19 = vadd.f32 %v1795_v20, %v1794_v4  ;;  %v1797_v37 = vpop.f32.mrb[14].mxu0 }
 0x199   : > { %v1798_v7 = vpop.f32.mrb[15].mxu0 }
 0x19a   : > { %v1799_v56 = vadd.f32 %v1798_v7, %v1797_v37 }
 0x19c   : > { %v1834_v2 = vpop.f32.mrb[12].mxu1 }
 0x19d   : > { %v1835_v25 = vpop.f32.mrb[13].mxu1 }
 0x19e   : > { %v1836_v8 = vadd.f32 %v1835_v25, %v1834_v2  ;;  %v1837_v17 = vpop.f32.mrb[14].mxu1  ;;  %v1858_v14 = vpop.f32.mrb[16].mxu0 }
 0x19f   : > { %v1838_v63 = vpop.f32.mrb[15].mxu1  ;;  %v1445_v54 = vadd.f32 %v1858_v14, %v1380_v39  ;;  %v1436_v12 = vpop.f32.mrb[17].mxu0 }
 0x1a0   : > { %v1839_v34 = vadd.f32 %v1838_v63, %v1837_v17  ;;  %v1396_v27 = vadd.f32 %v1836_v8, %v1796_v19  ;;  %v1437_v42 = vadd.f32 %v1436_v12, %v1372_v21  ;;  %v1859_v47 = vpop.f32.mrb[18].mxu0 }
 0x1a1   : > { %1505 = vst [vmem:[%s2641_s21 + $0x10] sm:$0xff] %v1445_v54  ;;  %v1448_v15 = vadd.f32 %v1859_v47, %v1383_v22  ;;  %v1439_v53 = vpop.f32.mrb[19].mxu0  ;;  %v1483_v16 = vmul.f32 %v1445_v54, %v1445_v54 }
 0x1a2   : > { %v1399_v28 = vadd.f32 %v1839_v34, %v1799_v56  ;;  %1503 = vst [vmem:[%s2641_s21] sm:$0xff] %v1437_v42  ;;  %v1440_v58 = vadd.f32 %v1439_v53, %v1375_v33  ;;  %v1481_v36 = vmul.f32 %v1437_v42, %v1437_v42 }
 0x1a3   : > { %1506 = vst [vmem:[%s2641_s21 + $0x18] sm:$0xff] %v1448_v15  ;;  %v1484_v41 = vmul.f32 %v1448_v15, %v1448_v15 }
 0x1a4   : > { %v1862_v35 = vpop.f32.mrb[16].mxu1  ;;  %v1467_v59 = vadd.f32 %v1440_v58, %v1437_v42  ;;  %v1482_v43 = vmul.f32 %v1440_v58, %v1440_v58  ;;  %1504 = vst [vmem:[%s2641_s21 + $0x8] sm:$0xff] %v1440_v58 }
 0x1a5   : > { %v1461_v57 = vadd.f32 %v1862_v35, %v1396_v27  ;;  %v1452_v5 = vpop.f32.mrb[17].mxu1 }
 0x1a6   : > { %v1453_v61 = vadd.f32 %v1452_v5, %v1388_v49  ;;  %v1863_v55 = vpop.f32.mrb[18].mxu1  ;;  %v1468_v9 = vadd.f32 %v1467_v59, %v1445_v54  ;;  %v1489_v1 = vadd.f32 %v1482_v43, %v1481_v36 }
 0x1a7   : > { %1509 = vst [vmem:[%s2641_s21 + $0x30] sm:$0xff] %v1461_v57  ;;  %v1464_v3 = vadd.f32 %v1863_v55, %v1399_v28  ;;  %v1455_v21 = vpop.f32.mrb[19].mxu1  ;;  %v1487_v6 = vmul.f32 %v1461_v57, %v1461_v57 }
 0x1a8   : > { %1507 = vst [vmem:[%s2641_s21 + $0x20] sm:$0xff] %v1453_v61  ;;  %v1456_v33 = vadd.f32 %v1455_v21, %v1391_v13  ;;  %v1490_v11 = vadd.f32 %v1489_v1, %v1483_v16  ;;  %v1469_v32 = vadd.f32 %v1468_v9, %v1448_v15  ;;  %v1485_v40 = vmul.f32 %v1453_v61, %v1453_v61 }
 0x1a9   : > { %1510 = vst [vmem:[%s2641_s21 + $0x38] sm:$0xff] %v1464_v3  ;;  %v1488_v39 = vmul.f32 %v1464_v3, %v1464_v3 }
 0x1aa   : > { %1508 = vst [vmem:[%s2641_s21 + $0x28] sm:$0xff] %v1456_v33  ;;  %v1470_v30 = vadd.f32 %v1469_v32, %v1453_v61  ;;  %v1491_v29 = vadd.f32 %v1490_v11, %v1484_v41  ;;  %v1486_v38 = vmul.f32 %v1456_v33, %v1456_v33 }
 0x1ac   : > { %v1492_v45 = vadd.f32 %v1491_v29, %v1485_v40  ;;  %v1471_v62 = vadd.f32 %v1470_v30, %v1456_v33 }
 0x1ae   : > { %v1472_v52 = vadd.f32 %v1471_v62, %v1461_v57  ;;  %v1493_v46 = vadd.f32 %v1492_v45, %v1486_v38 }
 0x1b0   : > { %v1473_v22 = vadd.f32 %v1472_v52, %v1464_v3  ;;  %v1494_v60 = vadd.f32 %v1493_v46, %v1487_v6 }
 0x1b2   : > { %v1474_v10 = vrot.slane %v1473_v22, 4  ;;  %v1495_v23 = vadd.f32 %v1494_v60, %v1488_v39 }
 0x1b4   : > { %v1475_v26 = vadd.f32 %v1474_v10, %v1473_v22  ;;  %v1496_v50 = vrot.slane %v1495_v23, 4 }
 0x1b6   : > { %v1476_v48 = vrot.slane %v1475_v26, 2  ;;  %v1497_v51 = vadd.f32 %v1496_v50, %v1495_v23 }
 0x1b8   : > { %v1477_v0 = vadd.f32 %v1476_v48, %v1475_v26  ;;  %v1498_v31 = vrot.slane %v1497_v51, 2 }
 0x1ba   : > { %v1478_v18 = vrot.slane %v1477_v0, 1  ;;  %v1499_v24 = vadd.f32 %v1498_v31, %v1497_v51 }
 0x1bc   : > { %v1500_v44 = vrot.slane %v1499_v24, 1  ;;  %v1479_v49 = vadd.f32 %v1478_v18, %v1477_v0 }
 0x1be   : > { %v1501_v13 = vadd.f32 %v1500_v44, %v1499_v24 }
 0x1c0   : > { %v1512_v4 = vsel %vm1511_vm7, %v1479_v49, %v1501_v13 }
 0x1c1   : > { %1513 = vst [vmem:[%s181_s26] sm:$0x3] %v1512_v4 }
 0x1c2 PF: > { %s14_s12 = sadd.s32 1, %s1936_s12  }
 0x1c3   : > { %p11_p4 = scmp.ge.s32.totalorder %s14_s12, 4  }
 0x1c5   :  { %13 = sbr.rel (!%p11_p4) target bundleno = 1 (0x1), region = 72 }

// kernel: down_forward.3
= control target key start
LH: loop header
LB: loop body
LE: loop exit
PB: predicated region body
PF: predicated region fallthrough
CT: control target
= control target key end

     0   :  { %s2739_s18 = smov 0   ;;  %s3504_s0 = inlined_call_operand.vmem [shape: f32[2,64,128], index: 0, kind: input, shape index: {}]   ;;  %s3505_s1 = inlined_call_operand.vmem [shape: f32[1,128], index: 1, kind: input, shape index: {}]   ;;  %s3506_s2 = inlined_call_operand.vmem [shape: f32[1,128], index: 2, kind: input, shape index: {}]   ;;  %s3507_s3 = inlined_call_operand.vmem [shape: bf16[1152,128], index: 3, kind: input, shape index: {}]   ;;  %s3508_s4 = inlined_call_operand.vmem [shape: f32[2,64,128], index: 4, kind: output, shape index: {0}]   ;;  %s3509_s5 = inlined_call_operand.vmem [shape: f32[2,2,128], index: 5, kind: output, shape index: {1}]  }
   0x1 LB: > { %s2231_s19 = sadd.s32 4294967295, %s2706_s18   ;;  %p2235_p0 = scmp.ge.s32.totalorder %s2706_s18, 1  ;;  %s2706_s18 = sphi %s2739_s18, %s16_s18  }
   0x2   : > { %p190_p1 = scmp.lt.s32.totalorder %s2706_s18, 3 }
   0x4   : > { %p191_p2 = pnand %p2235_p0, %p190_p1 }
   0x5   : > { %v2616_v0 = vld [vmem:[%s3507_s3 + $0xc0] sm:$0xff] (!%p191_p2)   ;;  %v2618_v2 = vld [vmem:[%s3507_s3 + $0xc8] sm:$0xff] (!%p191_p2)   ;;  %v2708_v3 = vmov (!%p191_p2), 0   ;;  %v2622_v7 = vld [vmem:[%s3507_s3 + $0xd0] sm:$0xff] (!%p191_p2)   ;;  %p222_p3 = scmp.lt.s32.totalorder (!%p191_p2), %s2231_s19, 1  ;;  %vm416_vm2 = vcmask (!%p191_p2), 1043456  }
   0x6   : > { %194 = sbr.rel (%p191_p2) target bundleno = 393 (0x189), region = 36  ;;  %v2617_v1 = vld [vmem:[%s3507_s3 + $0x80] sm:$0xff] (!%p191_p2)   ;;  %2435 = vmatprep.subr.bf16.mxu1 (!%p191_p2), %v2616_v0  ;;  %285 = vst [vmem:[#allocation2 + $0x8] sm:$0xf] (!%p191_p2), %v2708_v3  ;;  %287 = vst [vmem:[#allocation2 + $0x10] sm:$0xf] (!%p191_p2), %v2708_v3 }
   0x7   : > { %283 = vst [vmem:[#allocation2] sm:$0xf] (!%p191_p2), %v2708_v3  ;;  %284 = vst [vmem:[#allocation2 + $0x4] sm:$0x1] (!%p191_p2), %v2708_v3  ;;  %2436 = vmatpush3.bf16.msra.mxu1 (!%p191_p2), %v2617_v1  ;;  %v2619_v4 = vld [vmem:[%s3507_s3 + $0x88] sm:$0xff] (!%p191_p2)   ;;  %v2620_v5 = vld [vmem:[%s3507_s3 + $0x40] sm:$0xff] (!%p191_p2)  }
   0x8   : > { %286 = vst [vmem:[#allocation2 + $0xc] sm:$0x1] (!%p191_p2), %v2708_v3  ;;  %288 = vst [vmem:[#allocation2 + $0x14] sm:$0x1] (!%p191_p2), %v2708_v3  ;;  %2437 = vmatprep.subr.bf16.mxu1 (!%p191_p2), %v2618_v2  ;;  %v2621_v6 = vld [vmem:[%s3507_s3] sm:$0xff] (!%p191_p2)   ;;  %2395 = vmatprep.subr.bf16.mxu0 (!%p191_p2), %v2620_v5  ;;  %v2623_v8 = vld [vmem:[%s3507_s3 + $0x90] sm:$0xff] (!%p191_p2)  }
   0x9   : > { %289 = vst [vmem:[#allocation2 + $0x18] sm:$0xf] (!%p191_p2), %v2708_v3  ;;  %290 = vst [vmem:[#allocation2 + $0x1c] sm:$0x1] (!%p191_p2), %v2708_v3  ;;  %2396 = vmatpush3.bf16.msra.mxu0 (!%p191_p2), %v2621_v6  ;;  %v2624_v9 = vld [vmem:[%s3507_s3 + $0x48] sm:$0xff] (!%p191_p2)   ;;  %v2626_v11 = vld [vmem:[%s3507_s3 + $0xd8] sm:$0xff] (!%p191_p2)  }
   0xa   : > { %291 = vst [vmem:[#allocation2 + $0x20] sm:$0xf] (!%p191_p2), %v2708_v3  ;;  %292 = vst [vmem:[#allocation2 + $0x24] sm:$0x1] (!%p191_p2), %v2708_v3  ;;  %v2625_v10 = vld [vmem:[%s3507_s3 + $0x8] sm:$0xff] (!%p191_p2)   ;;  %2397 = vmatprep.subr.bf16.mxu0 (!%p191_p2), %v2624_v9  ;;  %v2627_v12 = vld [vmem:[%s3507_s3 + $0x98] sm:$0xff] (!%p191_p2)  }
   0xb   : > { %293 = vst [vmem:[#allocation2 + $0x28] sm:$0xf] (!%p191_p2), %v2708_v3  ;;  %294 = vst [vmem:[#allocation2 + $0x2c] sm:$0x1] (!%p191_p2), %v2708_v3  ;;  %2438 = vmatpush3.bf16.msra.mxu1 (!%p191_p2), %v2619_v4  ;;  %v2628_v13 = vld [vmem:[%s3507_s3 + $0x50] sm:$0xff] (!%p191_p2)   ;;  %v2630_v15 = vld [vmem:[%s3507_s3 + $0xe0] sm:$0xff] (!%p191_p2)  }
   0xc   : > { %295 = vst [vmem:[#allocation2 + $0x30] sm:$0xf] (!%p191_p2), %v2708_v3  ;;  %296 = vst [vmem:[#allocation2 + $0x34] sm:$0x1] (!%p191_p2), %v2708_v3  ;;  %2439 = vmatprep.subr.bf16.mxu1 (!%p191_p2), %v2622_v7  ;;  %v2629_v14 = vld [vmem:[%s3507_s3 + $0x10] sm:$0xff] (!%p191_p2)   ;;  %v2631_v16 = vld [vmem:[%s3507_s3 + $0xa0] sm:$0xff] (!%p191_p2)  }
   0xd   : > { %297 = vst [vmem:[#allocation2 + $0x38] sm:$0xf] %v2708_v3  ;;  %298 = vst [vmem:[#allocation2 + $0x3c] sm:$0x1] %v2708_v3  ;;  %2398 = vmatpush3.bf16.msra.mxu0 %v2625_v10  ;;  %v2632_v17 = vld [vmem:[%s3507_s3 + $0x58] sm:$0xff]   ;;  %v2634_v19 = vld [vmem:[%s3507_s3 + $0xe8] sm:$0xff]  }
   0xe   : > { %299 = vst [vmem:[#allocation2 + $0x40] sm:$0xf] %v2708_v3  ;;  %300 = vst [vmem:[#allocation2 + $0x44] sm:$0x1] %v2708_v3  ;;  %2399 = vmatprep.subr.bf16.mxu0 %v2628_v13  ;;  %v2633_v18 = vld [vmem:[%s3507_s3 + $0x18] sm:$0xff]   ;;  %v2635_v20 = vld [vmem:[%s3507_s3 + $0xa8] sm:$0xff]  }
   0xf   : > { %301 = vst [vmem:[#allocation2 + $0x48] sm:$0xf] %v2708_v3  ;;  %302 = vst [vmem:[#allocation2 + $0x4c] sm:$0x1] %v2708_v3  ;;  %2440 = vmatpush3.bf16.msra.mxu1 %v2623_v8  ;;  %v2636_v21 = vld [vmem:[%s3507_s3 + $0x60] sm:$0xff]   ;;  %s3519_s19 = smov (!%p222_p3, %s2231_s19), 1 }
  0x10   : > { %2441 = vmatprep.subr.bf16.mxu1 %v2626_v11  ;;  %v2637_v22 = vld [vmem:[%s3507_s3 + $0x20] sm:$0xff]   ;;  %v2638_v23 = vld [vmem:[%s3507_s3 + $0xf0] sm:$0xff]   ;;  %v2640_v25 = vld [vmem:[%s3507_s3 + $0x68] sm:$0xff]   ;;  %s2385_s24 = sshll.u32 %s3519_s19, 6  ;;  %vm417_vm0 = vsmask.f32 7938 }
  0x11   : > { %2400 = vmatpush3.bf16.msra.mxu0 %v2629_v14  ;;  %v2639_v24 = vld [vmem:[%s3507_s3 + $0xb0] sm:$0xff]   ;;  %v2641_v26 = vld [vmem:[%s3507_s3 + $0x28] sm:$0xff]   ;;  %v2642_v27 = vld [vmem:[%s3507_s3 + $0xf8] sm:$0xff]   ;;  %s2843_s8 = scalar_lea.vmem %s3504_s0, %s2385_s24  ;;  %vm423_vm1 = vsmask.f32 256  ;;  %vm422_vm3 = vcmask 1040384   ;;  %s231_s17 = scalar_lea.vmem %s3508_s4, %s2385_s24 }
  0x12   : > { %2401 = vmatprep.subr.bf16.mxu0 %v2632_v17  ;;  %v2643_v28 = vld [vmem:[%s3507_s3 + $0xb8] sm:$0xff]   ;;  %v2644_v29 = vld [vmem:[%s3507_s3 + $0x70] sm:$0xff]   ;;  %v237_v31 = vld [vmem:[%s2843_s8] sm:$0xff]  ;;  %vm769_vm6 = vcmask 1042432   ;;  %vm770_vm7 = vcmask 1046532   ;;  %s2240_s24 = sshll.u32 %s3519_s19, 1 }
  0x13   : > { %2442 = vmatpush3.bf16.msra.mxu1 %v2627_v12  ;;  %v2645_v30 = vld [vmem:[%s3507_s3 + $0x30] sm:$0xff]   ;;  %v238_v32 = vld [vmem:[%s2843_s8 + $0x8] sm:$0xff]  ;;  %v2856_v33 = vld [vmem:[%s3505_s1] ss:$0 sm:$0xff]  ;;  %vm630_vm9 = vsmask.f32 3328  ;;  %s235_s21 = scalar_lea.vmem %s3509_s5, %s2240_s24 }
  0x14   : > { %2443 = vmatprep.subr.bf16.mxu1 %v2630_v15  ;;  %v252_v34 = vmul.f32 %v2856_v33, %v237_v31  ;;  %v253_v35 = vmul.f32 %v2856_v33, %v238_v32  ;;  %v2863_v36 = vld [vmem:[%s3506_s2] ss:$0 sm:$0xff]  ;;  %v2649_v44 = vld [vmem:[%s3507_s3 + $0x78] sm:$0xff]   ;;  %vm2877_vm4 = vmand %vm416_vm2, %vm417_vm0  ;;  %vm631_vm10 = vsmask.f32 7440 }
  0x15   : > { %2402 = vmatpush3.bf16.msra.mxu0 %v2633_v18  ;;  %v2647_v41 = vld [vmem:[%s3507_s3 + $0x1c0] sm:$0xff]   ;;  %v2650_v45 = vld [vmem:[%s3507_s3 + $0x38] sm:$0xff]   ;;  %v419_v51 = vld [vmem:[#allocation2 + $0x8] sm:$0xf] }
  0x16   : > { %2403 = vmatprep.subr.bf16.mxu0 %v2636_v21  ;;  %v267_v37 = vadd.f32 %v2863_v36, %v252_v34  ;;  %v268_v38 = vadd.f32 %v2863_v36, %v253_v35  ;;  %v428_v52 = vld [vmem:[#allocation2 + $0x10] sm:$0xf]  ;;  %v425_v53 = vld [vmem:[#allocation2 + $0xc] sm:$0x1]  ;;  %vm2883_vm5 = vmand %vm422_vm3, %vm423_vm1 }
  0x17   : > { %2444 = vmatpush3.bf16.msra.mxu1 %v2631_v16  ;;  %v2887_v57 = vld [vmem:[#allocation2] sm:$0xf]  ;;  %v239_v59 = vld [vmem:[%s2843_s8 + $0x10] sm:$0xff]  ;;  %v240_v0 = vld [vmem:[%s2843_s8 + $0x18] sm:$0xff] }
  0x18   : > { %2445 = vmatprep.subr.bf16.mxu1 %v2634_v19  ;;  %v275_v39 = vmax.f32 %v267_v37, 0.0  ;;  %v276_v40 = vmax.f32 %v268_v38, 0.0  ;;  %v2653_v58 = vld [vmem:[%s3507_s3 + $0x140] sm:$0xff]   ;;  %v254_v3 = vmul.f32 %v2856_v33, %v239_v59  ;;  %v255_v4 = vmul.f32 %v2856_v33, %v240_v0  ;;  %v431_v9 = vld [vmem:[#allocation2 + $0x14] sm:$0x1]  ;;  %vm2908_vm8 = vmor %vm769_vm6, %vm770_vm7 }
  0x19   : > { %2404 = vmatpush3.bf16.msra.mxu0 %v2637_v22  ;;  %v622_v1 = vld [vmem:[#allocation2 + $0x4] sm:$0x1]  ;;  %v745_v2 = vld [vmem:[#allocation2] sm:$0xe]  ;;  %v634_v8 = vshrl.u32 %v2887_v57, 16  ;;  %v637_v10 = vshll.u32 %v2887_v57, 16  ;;  %vm2938_vm11 = vmor %vm630_vm9, %vm631_vm10 }
  0x1a   : > { %2405 = vmatprep.subr.bf16.mxu0 %v2640_v25  ;;  %v2387_v42 = vpack.c.bf16 %v275_v39, %v275_v39  ;;  %v2388_v43 = vpack.c.bf16 %v276_v40, %v276_v40  ;;  %v269_v11 = vadd.f32 %v2863_v36, %v254_v3  ;;  %v270_v12 = vadd.f32 %v2863_v36, %v255_v4  ;;  %v2657_v4 = vld [vmem:[%s3507_s3 + $0x1d0] sm:$0xff]   ;;  %v3405_v56 = vld [vmem:[%s3507_s3 + $0x228] sm:$0xff]  }
  0x1b   : > { %2446 = vmatpush3.bf16.msra.mxu1 %v2635_v20  ;;  %v2251_v14 = vrot.slane %v745_v2, 9  ;;  %v774_v15 = vrot.slane %v622_v1, 5  ;;  %v636_v18 = vrot.slane %v634_v8, 4  ;;  %v639_v19 = vrot.slane %v637_v10, 5  ;;  %v2652_v2 = vld [vmem:[%s3507_s3 + $0x188] sm:$0xff]   ;;  %v241_v10 = vld [vmem:[%s2843_s8 + $0x20] sm:$0xff] }
  0x1c   : > { %2447 = vmatprep.subr.bf16.mxu1 %v2638_v23  ;;  %v336_v46 = vshrl.u32 %v2387_v42, 16  ;;  %v339_v47 = vshll.u32 %v2387_v42, 16  ;;  %v344_v48 = vshrl.u32 %v2388_v43, 16  ;;  %v347_v49 = vshll.u32 %v2388_v43, 16  ;;  %v2648_v43 = vld [vmem:[%s3507_s3 + $0x180] sm:$0xff]  }
  0x1d   : > { %2406 = vmatpush3.bf16.msra.mxu0 %v2641_v26  ;;  %v277_v16 = vmax.f32 %v269_v11, 0.0  ;;  %v278_v17 = vmax.f32 %v270_v12, 0.0  ;;  %v643_v23 = vshll.u32 %v622_v1, 16 }
  0x1e   : > { %2407 = vmatprep.subr.bf16.mxu0 %v2644_v29  ;;  %v338_v54 = vrot.slane %v336_v46, 7  ;;  %v346_v55 = vrot.slane %v344_v48, 7  ;;  %v640_v29 = vor.u32 %v639_v19, %v636_v18 }
  0x1f   : > { %2448 = vmatpush3.bf16.msra.mxu1 %v2639_v24  ;;  %v2389_v20 = vpack.c.bf16 %v277_v16, %v277_v16  ;;  %v2390_v22 = vpack.c.bf16 %v278_v17, %v278_v17  ;;  %v2923_v39 = vrot.slane %v643_v23, 5  ;;  %v443_v16 = vld [vmem:[#allocation2 + $0x24] sm:$0x1] }
  0x20   : > { %2449 = vmatprep.subr.bf16.mxu1 %v2642_v27  ;;  %v341_v60 = vor.u32 %v339_v47, %v338_v54  ;;  %v342_v61 = vrot.slane %v338_v54, 4  ;;  %v349_v62 = vor.u32 %v347_v49, %v346_v55  ;;  %v350_v63 = vrot.slane %v346_v55, 4  ;;  %v437_v54 = vld [vmem:[#allocation2 + $0x1c] sm:$0x1]  ;;  %v2656_v23 = vld [vmem:[%s3507_s3 + $0x100] sm:$0xff]  }
  0x21   : > { %2408 = vmatpush3.bf16.msra.mxu0 %v2645_v30  ;;  %v352_v30 = vshrl.u32 %v2389_v20, 16  ;;  %v360_v37 = vshrl.u32 %v2390_v22, 16  ;;  %v363_v47 = vshll.u32 %v2390_v22, 16 }
  0x22   : > { %2409 = vmatprep.subr.bf16.mxu0 %v2649_v44  ;;  %v420_v5 = vsel %vm2877_vm4, %v341_v60, %v419_v51  ;;  %v429_v6 = vsel %vm2877_vm4, %v349_v62, %v428_v52  ;;  %v426_v7 = vsel %vm2883_vm5, %v342_v61, %v425_v53  ;;  %v432_v13 = vsel %vm2883_vm5, %v350_v63, %v431_v9  ;;  %v2651_v44 = vld [vmem:[%s3507_s3 + $0x1c8] sm:$0xff]   ;;  %v434_v52 = vld [vmem:[#allocation2 + $0x18] sm:$0xf]  ;;  %v440_v53 = vld [vmem:[#allocation2 + $0x20] sm:$0xf] }
  0x23   : > { %2450 = vmatpush3.bf16.msra.mxu1 %v2643_v28  ;;  %421 = vst [vmem:[#allocation2 + $0x8] sm:$0xf] %v420_v5  ;;  %430 = vst [vmem:[#allocation2 + $0x10] sm:$0xf] %v429_v6  ;;  %v775_v28 = vsel %vm2908_vm8, %v2251_v14, %v774_v15  ;;  %v641_v51 = vrot.slane %v640_v29, 4  ;;  %v354_v60 = vrot.slane %v352_v30, 7  ;;  %v256_v29 = vmul.f32 %v2856_v33, %v241_v10 }
  0x24   : > { %2515 = vmatprep.subr.bf16.mxu1 %v2647_v41  ;;  %427 = vst [vmem:[#allocation2 + $0xc] sm:$0x1] %v426_v7  ;;  %433 = vst [vmem:[#allocation2 + $0x14] sm:$0x1] %v432_v13  ;;  %v355_v41 = vshll.u32 %v2389_v20, 16  ;;  %v362_v61 = vrot.slane %v360_v37, 7 }
  0x25   : > { %2410 = vmatpush3.bf16.msra.mxu0 %v2650_v45  ;;  %v358_v7 = vrot.slane %v354_v60, 4  ;;  %v646_v11 = vsel %vm2938_vm11, %v641_v51, %v2923_v39  ;;  %v242_v15 = vld [vmem:[%s2843_s8 + $0x28] sm:$0xff]  ;;  %v2663_v51 = vld [vmem:[%s3507_s3 + $0x150] sm:$0xff]  }
  0x26   : > { %2475 = vmatprep.subr.bf16.mxu0 %v2653_v58  ;;  %v357_v6 = vor.u32 %v355_v41, %v354_v60  ;;  %v365_v8 = vor.u32 %v363_v47, %v362_v61  ;;  %v366_v12 = vrot.slane %v362_v61, 4 }
  0x27   : > { %v438_v20 = vsel %vm2883_vm5, %v358_v7, %v437_v54 }
  0x28   : > { %v435_v18 = vsel %vm2877_vm4, %v357_v6, %v434_v52  ;;  %v441_v19 = vsel %vm2877_vm4, %v365_v8, %v440_v53  ;;  %439 = vst [vmem:[#allocation2 + $0x1c] sm:$0x1] %v438_v20  ;;  %v444_v37 = vsel %vm2883_vm5, %v366_v12, %v443_v16  ;;  %v2671_v20 = vld [vmem:[%s3507_s3 + $0x1e8] sm:$0xff]  }
  0x29   : > { %436 = vst [vmem:[#allocation2 + $0x18] sm:$0xf] %v435_v18  ;;  %442 = vst [vmem:[#allocation2 + $0x20] sm:$0xf] %v441_v19  ;;  %v2669_v19 = vld [vmem:[%s3507_s3 + $0x158] sm:$0xff]  }
  0x2a   : > { %v2912_v24 = vld [vmem:[#allocation2 + $0x8] sm:$0xf]  ;;  %v2914_v25 = vld [vmem:[#allocation2 + $0x10] sm:$0xf]  ;;  %445 = vst [vmem:[#allocation2 + $0x24] sm:$0x1] %v444_v37 }
  0x2b   : > { %v623_v26 = vld [vmem:[#allocation2 + $0xc] sm:$0x1]  ;;  %v746_v27 = vld [vmem:[#allocation2 + $0x8] sm:$0xe]  ;;  %v2287_v31 = vcombine.low %v2912_v24, %v2914_v25  ;;  %v821_v38 = vshrl.u32 %v2912_v24, 16  ;;  %v824_v48 = vshll.u32 %v2912_v24, 16 }
  0x2c   : > { %v2252_v32 = vrot.slane %v746_v27, 9  ;;  %v778_v34 = vrot.slane %v623_v26, 5  ;;  %v2920_v35 = vld [vmem:[#allocation2 + $0x8] sm:$0xf]  ;;  %v657_v40 = vshll.u32 %v623_v26, 16  ;;  %v835_v0 = vshrl.u32 %v2914_v25, 16 }
  0x2d   : > { %1870 = vmatprep.mubr.bf16.mxu1 %v2287_v31  ;;  %v648_v45 = vshrl.u32 %v2920_v35, 16  ;;  %v651_v46 = vshll.u32 %v2920_v35, 16  ;;  %v2942_v62 = vld [vmem:[#allocation2 + $0x10] sm:$0xf]  ;;  %v2944_v63 = vrot.slane %v821_v38, 4  ;;  %v838_v1 = vshll.u32 %v2914_v25, 16 }
  0x2e   : > { %v779_v42 = vsel %vm2908_vm8, %v2252_v32, %v778_v34  ;;  %v659_v3 = vrot.slane %v657_v40, 5  ;;  %v2954_v9 = vld [vmem:[#allocation2 + $0x14] sm:$0x1]  ;;  %v662_v13 = vshrl.u32 %v2942_v62, 16  ;;  %v665_v14 = vshll.u32 %v2942_v62, 16  ;;  %v2659_v32 = vld [vmem:[%s3507_s3 + $0x148] sm:$0xff]  }
  0x2f   : > { %v2283_v49 = vcombine.low %v775_v28, %v779_v42  ;;  %v650_v58 = vrot.slane %v648_v45, 4  ;;  %v653_v59 = vrot.slane %v651_v46, 5  ;;  %v747_v22 = vld [vmem:[#allocation2 + $0x10] sm:$0xe]  ;;  %v671_v28 = vshll.u32 %v2954_v9, 16  ;;  %v2661_v40 = vld [vmem:[%s3507_s3 + $0x1d8] sm:$0xff]  }
  0x30   : > { %v2658_v25 = vld [vmem:[%s3507_s3 + $0x190] sm:$0xff]   ;;  %v664_v26 = vrot.slane %v662_v13, 4  ;;  %v667_v27 = vrot.slane %v665_v14, 5  ;;  %v2275_v31 = vcombine.low %v2887_v57, %v2920_v35  ;;  %v257_v34 = vmul.f32 %v2856_v33, %v242_v15  ;;  %v2662_v57 = vld [vmem:[%s3507_s3 + $0x198] sm:$0xff]  }
  0x31   : > { %1871 = vmatmul.mubr.bf16.vlgmr.msra.gmra.mrb[0].mxu1 %v2283_v49  ;;  %v654_v5 = vor.u32 %v653_v59, %v650_v58  ;;  %v2253_v39 = vrot.slane %v747_v22, 9  ;;  %v271_v42 = vadd.f32 %v2863_v36, %v256_v29  ;;  %v3001_v46 = vrot.slane %v671_v28, 5  ;;  %v2667_v58 = vld [vmem:[%s3507_s3 + $0x1e0] sm:$0xff]   ;;  %v243_v24 = vld [vmem:[%s2843_s8 + $0x30] sm:$0xff]  ;;  %v625_v60 = vld [vmem:[#allocation2 + $0x1c] sm:$0x1] }
  0x32   : > { %2516 = vmatpush3.bf16.msra.mxu1 %v2648_v43  ;;  %v668_v41 = vor.u32 %v667_v27, %v664_v26  ;;  %v272_v35 = vadd.f32 %v2863_v36, %v257_v34  ;;  %v782_v43 = vrot.slane %v2954_v9, 5  ;;  %v3005_v49 = vrot.slane %v824_v48, 5  ;;  %v806_v48 = vld [vmem:[#allocation2 + $0x18] sm:$0xf]  ;;  %v3018_v59 = vld [vmem:[#allocation2 + $0x20] sm:$0xf] }
  0x33   : > { %2517 = vmatprep.subr.bf16.mxu1 %v2651_v44  ;;  %v655_v17 = vrot.slane %v654_v5, 4  ;;  %v2660_v44 = vld [vmem:[%s3507_s3 + $0x108] sm:$0xff]   ;;  %v279_v47 = vmax.f32 %v271_v42, 0.0  ;;  %v3010_v53 = vrot.slane %v835_v0, 4  ;;  %v3012_v54 = vrot.slane %v838_v1, 5  ;;  %v2668_v9 = vld [vmem:[%s3507_s3 + $0x1a0] sm:$0xff]  }
  0x34   : > { %v2999_v45 = vrot.slane %v668_v41, 4  ;;  %v280_v52 = vmax.f32 %v272_v35, 0.0  ;;  %v849_v61 = vshrl.u32 %v806_v48, 16  ;;  %v783_v0 = vsel %vm2908_vm8, %v2253_v39, %v782_v43  ;;  %v3027_v7 = vld [vmem:[#allocation2 + $0x18] sm:$0xf]  ;;  %v2666_v13 = vld [vmem:[%s3507_s3 + $0x110] sm:$0xff]  }
  0x35   : > { %v660_v30 = vsel %vm2938_vm11, %v655_v17, %v659_v3  ;;  %v2391_v3 = vpack.c.bf16 %v279_v47, %v279_v47  ;;  %v786_v6 = vrot.slane %v625_v60, 5  ;;  %v852_v10 = vshll.u32 %v806_v48, 16  ;;  %v244_v22 = vld [vmem:[%s2843_s8 + $0x38] sm:$0xff]  ;;  %v2672_v29 = vld [vmem:[%s3507_s3 + $0x1a8] sm:$0xff]  }
  0x36   : > { %2518 = vmatpush3.bf16.msra.mxu1 %v2652_v2  ;;  %v2279_v38 = vcombine.low %v646_v11, %v660_v30  ;;  %v748_v2 = vld [vmem:[#allocation2 + $0x18] sm:$0xe]  ;;  %v674_v1 = vsel %vm2938_vm11, %v2999_v45, %v3001_v46  ;;  %v2392_v8 = vpack.c.bf16 %v280_v52, %v280_v52  ;;  %v863_v11 = vshrl.u32 %v3018_v59, 16  ;;  %v3057_v30 = vld [vmem:[#allocation2 + $0x20] sm:$0xf] }
  0x37   : > { %2519 = vmatprep.subr.bf16.mxu1 %v2657_v4  ;;  %v2288_v4 = vcombine.low %v806_v48, %v3018_v59  ;;  %v2254_v5 = vrot.slane %v748_v2, 9  ;;  %v866_v12 = vshll.u32 %v3018_v59, 16  ;;  %v258_v14 = vmul.f32 %v2856_v33, %v243_v24  ;;  %v2670_v28 = vld [vmem:[%s3507_s3 + $0x118] sm:$0xff]   ;;  %v449_v39 = vld [vmem:[#allocation2 + $0x2c] sm:$0x1]  ;;  %v2673_v48 = vld [vmem:[%s3507_s3 + $0x160] sm:$0xff]  }
  0x38   : > { %1805 = vmatprep.mubr.bf16.mxu0 %v2279_v38  ;;  %v676_v16 = vshrl.u32 %v3027_v7, 16  ;;  %v679_v17 = vshll.u32 %v3027_v7, 16  ;;  %v685_v18 = vshll.u32 %v625_v60, 16  ;;  %v368_v26 = vshrl.u32 %v2391_v3, 16  ;;  %v446_v38 = vld [vmem:[#allocation2 + $0x28] sm:$0xf] }
  0x39   : > { %1806 = vmatmul.mubr.bf16.vlgmr.msra.gmra.mrb[0].mxu0 %v2275_v31  ;;  %1878 = vmatprep.mubr.bf16.mxu1 %v2288_v4  ;;  %v787_v15 = vsel %vm2908_vm8, %v2254_v5, %v786_v6  ;;  %v371_v27 = vshll.u32 %v2391_v3, 16  ;;  %v376_v34 = vshrl.u32 %v2392_v8, 16  ;;  %v379_v37 = vshll.u32 %v2392_v8, 16  ;;  %v455_v3 = vld [vmem:[#allocation2 + $0x34] sm:$0x1]  ;;  %v3142_v59 = vld [vmem:[%s3507_s3 + $0x200] sm:$0xff]  }
  0x3a   : > { %2520 = vmatpush3.bf16.msra.mxu1 %v2658_v25  ;;  %2476 = vmatpush3.bf16.msra.mxu0 %v2656_v23  ;;  %v3049_v23 = vrot.slane %v849_v61, 4  ;;  %v2284_v25 = vcombine.low %v783_v0, %v787_v15  ;;  %v678_v31 = vrot.slane %v676_v16, 4  ;;  %v3061_v41 = vrot.slane %v852_v10, 5  ;;  %v2676_v0 = vld [vmem:[%s3507_s3 + $0x120] sm:$0xff]  }
  0x3b   : > { %2521 = vmatprep.subr.bf16.mxu1 %v2661_v40  ;;  %2477 = vmatprep.subr.bf16.mxu0 %v2659_v32  ;;  %v681_v32 = vrot.slane %v679_v17, 5  ;;  %v3059_v40 = vld [vmem:[#allocation2 + $0x20] sm:$0xe]  ;;  %v370_v42 = vrot.slane %v368_v26, 7  ;;  %v690_v35 = vshrl.u32 %v3057_v30, 16  ;;  %v259_v43 = vmul.f32 %v2856_v33, %v244_v22  ;;  %v2679_v17 = vld [vmem:[%s3507_s3 + $0x168] sm:$0xff]  }
  0x3c   : > { %1879 = vmatmul.mubr.bf16.gmra.mrb[4].mxu1 %v2284_v25  ;;  %v378_v52 = vrot.slane %v376_v34, 7  ;;  %v693_v24 = vshll.u32 %v3057_v30, 16  ;;  %v2255_v33 = vrot.slane %v3059_v40, 9  ;;  %v273_v16 = vadd.f32 %v2863_v36, %v258_v14  ;;  %v2685_v40 = vld [vmem:[%s3507_s3 + $0x130] sm:$0xff]  }
  0x3d   : > { %v682_v47 = vor.u32 %v681_v32, %v678_v31  ;;  %v373_v60 = vor.u32 %v371_v27, %v370_v42  ;;  %v374_v61 = vrot.slane %v370_v42, 4  ;;  %v692_v2 = vrot.slane %v690_v35, 4  ;;  %v2683_v31 = vld [vmem:[%s3507_s3 + $0x170] sm:$0xff]  }
  0x3e   : > { %2522 = vmatpush3.bf16.msra.mxu1 %v2662_v57  ;;  %2478 = vmatpush3.bf16.msra.mxu0 %v2660_v44  ;;  %v452_v57 = vld [vmem:[#allocation2 + $0x30] sm:$0xf]  ;;  %v381_v5 = vor.u32 %v379_v37, %v378_v52  ;;  %v382_v6 = vrot.slane %v378_v52, 4  ;;  %v695_v8 = vrot.slane %v693_v24, 5  ;;  %v274_v22 = vadd.f32 %v2863_v36, %v259_v43  ;;  %v2680_v36 = vld [vmem:[%s3507_s3 + $0x128] sm:$0xff]  }
  0x3f   : > { %2523 = vmatprep.subr.bf16.mxu1 %v2667_v58  ;;  %2479 = vmatprep.subr.bf16.mxu0 %v2663_v51  ;;  %v2677_v44 = vld [vmem:[%s3507_s3 + $0x1f0] sm:$0xff]   ;;  %v687_v51 = vrot.slane %v685_v18, 5  ;;  %v3068_v58 = vld [vmem:[#allocation2 + $0x24] sm:$0x1]  ;;  %v683_v4 = vrot.slane %v682_v47, 4  ;;  %v447_v10 = vsel %vm2877_vm4, %v373_v60, %v446_v38  ;;  %v281_v25 = vmax.f32 %v273_v16, 0.0 }
  0x40   : > { %v699_v15 = vshll.u32 %v3068_v58, 16  ;;  %448 = vst [vmem:[#allocation2 + $0x28] sm:$0xf] %v447_v10  ;;  %v456_v26 = vsel %vm2883_vm5, %v382_v6, %v455_v3  ;;  %v282_v27 = vmax.f32 %v274_v22, 0.0  ;;  %v790_v45 = vrot.slane %v3068_v58, 5 }
  0x41   : > { %v688_v18 = vsel %vm2938_vm11, %v683_v4, %v687_v51  ;;  %457 = vst [vmem:[#allocation2 + $0x34] sm:$0x1] %v456_v26  ;;  %v3111_v46 = vpack.c.bf16 %v281_v25, %v281_v25  ;;  %v3127_v32 = vrot.slane %v866_v12, 5  ;;  %v827_v12 = vor.u32 %v3005_v49, %v2944_v63  ;;  %v464_v26 = vld [vmem:[#allocation2 + $0x40] sm:$0xf] }
  0x42   : > { %2524 = vmatpush3.bf16.msra.mxu1 %v2668_v9  ;;  %2480 = vmatpush3.bf16.msra.mxu0 %v2666_v13  ;;  %v2678_v9 = vld [vmem:[%s3507_s3 + $0x1b0] sm:$0xff]   ;;  %v450_v13 = vsel %vm2883_vm5, %v374_v61, %v449_v39  ;;  %v2280_v14 = vcombine.low %v674_v1, %v688_v18  ;;  %v2682_v1 = vld [vmem:[%s3507_s3 + $0x1b8] sm:$0xff]   ;;  %v3129_v34 = vrot.slane %v699_v15, 5  ;;  %v841_v42 = vor.u32 %v3012_v54, %v3010_v53 }
  0x43   : > { %2481 = vmatprep.subr.bf16.mxu0 %v2669_v19  ;;  %2525 = vmatprep.subr.bf16.mxu1 %v2671_v20  ;;  %v2276_v19 = vcombine.low %v2942_v62, %v3027_v7  ;;  %v453_v20 = vsel %vm2877_vm4, %v381_v5, %v452_v57  ;;  %451 = vst [vmem:[#allocation2 + $0x2c] sm:$0x1] %v450_v13  ;;  %v2681_v62 = vld [vmem:[%s3507_s3 + $0x1f8] sm:$0xff]   ;;  %v387_v38 = vshll.u32 %v3111_v46, 16 }
  0x44   : > { %454 = vst [vmem:[#allocation2 + $0x30] sm:$0xf] %v453_v20  ;;  %v696_v7 = vor.u32 %v695_v8, %v692_v2  ;;  %1813 = vmatprep.mubr.bf16.mxu0 %v2280_v14  ;;  %v855_v47 = vor.u32 %v3061_v41, %v3049_v23 }
  0x45   : > { %1814 = vmatmul.mubr.bf16.gmra.mrb[4].mxu0 %v2276_v19  ;;  %v2689_v19 = vld [vmem:[%s3507_s3 + $0x138] sm:$0xff]  }
  0x46   : > { %2526 = vmatpush3.bf16.msra.mxu1 %v2672_v29  ;;  %2482 = vmatpush3.bf16.msra.mxu0 %v2670_v28  ;;  %v3118_v28 = vrot.slane %v863_v11, 4  ;;  %v3120_v29 = vpack.c.bf16 %v282_v27, %v282_v27  ;;  %v3131_v37 = vrot.slane %v696_v7, 4  ;;  %v384_v11 = vshrl.u32 %v3111_v46, 16 }
  0x47   : > { %2527 = vmatprep.subr.bf16.mxu1 %v2677_v44  ;;  %2483 = vmatprep.subr.bf16.mxu0 %v2673_v48  ;;  %v808_v57 = vld [vmem:[#allocation2 + $0x28] sm:$0xf]  ;;  %v791_v44 = vsel %vm2908_vm8, %v2255_v33, %v790_v45  ;;  %v2688_v33 = vld [vmem:[%s3507_s3 + $0x178] sm:$0xff]  }
  0x48   : > { %v392_v39 = vshrl.u32 %v3120_v29, 16  ;;  %v750_v43 = vld [vmem:[#allocation2 + $0x28] sm:$0xe]  ;;  %v877_v52 = vshrl.u32 %v808_v57, 16  ;;  %v880_v58 = vshll.u32 %v808_v57, 16  ;;  %v395_v8 = vshll.u32 %v3120_v29, 16 }
  0x49   : > { %v2256_v24 = vrot.slane %v750_v43, 9  ;;  %v386_v25 = vrot.slane %v384_v11, 7  ;;  %v702_v11 = vsel %vm2938_vm11, %v3131_v37, %v3129_v34  ;;  %v3190_v43 = vld [vmem:[#allocation2 + $0x18] sm:$0xf] }
  0x4a   : > { %2528 = vmatpush3.bf16.msra.mxu1 %v2678_v9  ;;  %2484 = vmatpush3.bf16.msra.mxu0 %v2676_v0  ;;  %v627_v35 = vld [vmem:[#allocation2 + $0x2c] sm:$0x1]  ;;  %v3153_v0 = vld [vmem:[#allocation2 + $0x28] sm:$0xf]  ;;  %v3158_v4 = vrot.slane %v877_v52, 4  ;;  %v3166_v10 = vrot.slane %v880_v58, 5 }
  0x4b   : > { %2485 = vmatprep.subr.bf16.mxu0 %v2679_v17  ;;  %2529 = vmatprep.subr.bf16.mxu1 %v2681_v62  ;;  %v809_v51 = vld [vmem:[#allocation2 + $0x30] sm:$0xf]  ;;  %v794_v48 = vrot.slane %v627_v35, 5  ;;  %v713_v3 = vshll.u32 %v627_v35, 16  ;;  %v704_v6 = vshrl.u32 %v3153_v0, 16  ;;  %v707_v16 = vshll.u32 %v3153_v0, 16 }
  0x4c   : > { %v891_v60 = vshrl.u32 %v809_v51, 16  ;;  %v894_v61 = vshll.u32 %v809_v51, 16  ;;  %v2289_v2 = vcombine.low %v808_v57, %v809_v51  ;;  %v3164_v9 = vld [vmem:[#allocation2 + $0x34] sm:$0x1]  ;;  %v458_v17 = vld [vmem:[#allocation2 + $0x38] sm:$0xf] }
  0x4d   : > { %v795_v5 = vsel %vm2908_vm8, %v2256_v24, %v794_v48  ;;  %v751_v18 = vld [vmem:[#allocation2 + $0x30] sm:$0xe]  ;;  %v706_v22 = vrot.slane %v704_v6, 4  ;;  %v715_v14 = vrot.slane %v713_v3, 5  ;;  %v709_v7 = vrot.slane %v707_v16, 5 }
  0x4e   : > { %2530 = vmatpush3.bf16.msra.mxu1 %v2682_v1  ;;  %2486 = vmatpush3.bf16.msra.mxu0 %v2680_v36  ;;  %v3168_v13 = vrot.slane %v891_v60, 4  ;;  %v2285_v15 = vcombine.low %v791_v44, %v795_v5  ;;  %v3174_v20 = vrot.slane %v894_v61, 5  ;;  %v3176_v62 = vld [vmem:[#allocation2 + $0x30] sm:$0xf]  ;;  %v3178_v27 = vrot.slane %v392_v39, 7 }
  0x4f   : > { %2487 = vmatprep.subr.bf16.mxu0 %v2683_v31  ;;  %2591 = vmatprep.subr.bf16.mxu1 %v3142_v59  ;;  %v461_v36 = vld [vmem:[#allocation2 + $0x3c] sm:$0x1]  ;;  %v2257_v45 = vrot.slane %v751_v18, 9  ;;  %v798_v46 = vrot.slane %v3164_v9, 5  ;;  %v389_v1 = vor.u32 %v387_v38, %v386_v25  ;;  %v390_v29 = vrot.slane %v386_v25, 4 }
  0x50   : > { %1886 = vmatprep.mubr.bf16.mxu1 %v2289_v2  ;;  %v718_v31 = vshrl.u32 %v3176_v62, 16  ;;  %v3183_v57 = vld [vmem:[#allocation2 + $0x10] sm:$0xf]  ;;  %v710_v35 = vor.u32 %v709_v7, %v706_v22  ;;  %v397_v39 = vor.u32 %v395_v8, %v3178_v27  ;;  %v3192_v44 = vld [vmem:[#allocation2 + $0x14] sm:$0x1]  ;;  %v869_v38 = vor.u32 %v3127_v32, %v3118_v28 }
  0x51   : > { %1887 = vmatmul.mubr.bf16.gmra.mrb[8].mxu1 %v2285_v15  ;;  %v459_v51 = vsel %vm2877_vm4, %v389_v1, %v458_v17  ;;  %v462_v52 = vsel %vm2883_vm5, %v390_v29, %v461_v36  ;;  %v727_v48 = vshll.u32 %v3164_v9, 16  ;;  %v1006_v28 = vshrl.u32 %v3183_v57, 16  ;;  %v3207_v61 = vld [vmem:[#allocation2 + $0x1c] sm:$0x1]  ;;  %v813_v25 = vld [vmem:[#allocation2 + $0x14] sm:$0x1] }
  0x52   : > { %2488 = vmatpush3.bf16.msra.mxu0 %v2685_v40  ;;  %v721_v40 = vshll.u32 %v3176_v62, 16  ;;  %v720_v58 = vrot.slane %v718_v31, 4  ;;  %v711_v34 = vrot.slane %v710_v35, 4  ;;  %460 = vst [vmem:[#allocation2 + $0x38] sm:$0xf] %v459_v51  ;;  %v465_v37 = vsel %vm2877_vm4, %v397_v39, %v464_v26 }
  0x53   : > { %2489 = vmatprep.subr.bf16.mxu0 %v2688_v33  ;;  %463 = vst [vmem:[#allocation2 + $0x3c] sm:$0x1] %v462_v52  ;;  %v2277_v32 = vcombine.low %v3057_v30, %v3153_v0  ;;  %466 = vst [vmem:[#allocation2 + $0x40] sm:$0xf] %v465_v37  ;;  %v1009_v2 = vshll.u32 %v3183_v57, 16  ;;  %v1020_v3 = vshrl.u32 %v3190_v43, 16  ;;  %v799_v22 = vsel %vm2908_vm8, %v2257_v45, %v798_v46 }
  0x54   : > { %v723_v24 = vrot.slane %v721_v40, 5  ;;  %v716_v50 = vsel %vm2938_vm11, %v711_v34, %v715_v14  ;;  %v3213_v33 = vrot.slane %v727_v48, 5  ;;  %v1015_v5 = vshll.u32 %v3192_v44, 16  ;;  %v932_v37 = vld [vmem:[#allocation2 + $0x8] sm:$0xe] }
  0x55   : > { %v1023_v6 = vshll.u32 %v3190_v43, 16  ;;  %v2281_v8 = vcombine.low %v702_v11, %v716_v50  ;;  %v1008_v30 = vrot.slane %v1006_v28, 4  ;;  %v1011_v0 = vrot.slane %v1009_v2, 5  ;;  %v933_v2 = vld [vmem:[#allocation2 + $0x10] sm:$0xe] }
  0x56   : > { %2490 = vmatpush3.bf16.msra.mxu0 %v2689_v19  ;;  %v724_v60 = vor.u32 %v723_v24, %v720_v58  ;;  %v3222_v15 = vrot.slane %v827_v12, 4  ;;  %v3227_v16 = vrot.slane %v841_v42, 4  ;;  %v1022_v17 = vrot.slane %v1020_v3, 4  ;;  %v812_v42 = vld [vmem:[#allocation2 + $0xc] sm:$0x1] }
  0x57   : > { %2567 = vmatprep.subr.bf16.mxu0 %v3142_v59  ;;  %v1025_v18 = vrot.slane %v1023_v6, 5  ;;  %1821 = vmatprep.mubr.bf16.mxu0 %v2281_v8  ;;  %v398_v19 = vrot.slane %v3178_v27, 4  ;;  %v3235_v14 = vrot.slane %v855_v47, 4  ;;  %v3237_v63 = vrot.slane %v869_v38, 4  ;;  %v3265_v8 = vld [vmem:[#allocation2 + $0x20] sm:$0xf] }
  0x58   : > { %v3217_v9 = vrot.slane %v724_v60, 4  ;;  %1822 = vmatmul.mubr.bf16.gmra.mrb[8].mxu0 %v2277_v32  ;;  %v1017_v53 = vrot.slane %v1015_v5, 5  ;;  %v1029_v54 = vshll.u32 %v3207_v61, 16  ;;  %v2299_v12 = vcombine.low %v3183_v57, %v3190_v43 }
  0x59   : > { %v810_v26 = vld [vmem:[#allocation2 + $0x38] sm:$0xf]  ;;  %v1012_v47 = vor.u32 %v1011_v0, %v1008_v30  ;;  %v1026_v7 = vor.u32 %v1025_v18, %v1022_v17  ;;  %v883_v36 = vor.u32 %v3166_v10, %v3158_v4  ;;  %v897_v45 = vor.u32 %v3174_v20, %v3168_v13 }
  0x5a   : > { %v730_v49 = vsel %vm2938_vm11, %v3217_v9, %v3213_v33  ;;  %v629_v23 = vld [vmem:[#allocation2 + $0x3c] sm:$0x1]  ;;  %v752_v41 = vld [vmem:[#allocation2 + $0x38] sm:$0xe]  ;;  %v3250_v46 = vld [vmem:[#allocation2 + $0x40] sm:$0xf] }
  0x5b   : > { %v905_v1 = vshrl.u32 %v810_v26, 16  ;;  %v908_v29 = vshll.u32 %v810_v26, 16  ;;  %v2258_v31 = vrot.slane %v752_v41, 9  ;;  %v802_v40 = vrot.slane %v629_v23, 5  ;;  %v3253_v35 = vld [vmem:[#allocation2 + $0x38] sm:$0xf] }
  0x5c   : > { %v2290_v11 = vcombine.low %v810_v26, %v3250_v46  ;;  %v741_v39 = vshll.u32 %v629_v23, 16  ;;  %v830_v38 = vshll.u32 %v812_v42, 16  ;;  %v844_v51 = vshll.u32 %v813_v25, 16  ;;  %v3269_v26 = vld [vmem:[#allocation2 + $0x24] sm:$0x1] }
  0x5d   : > { %v919_v52 = vshrl.u32 %v3250_v46, 16  ;;  %v803_v58 = vsel %vm2908_vm8, %v2258_v31, %v802_v40  ;;  %v732_v24 = vshrl.u32 %v3253_v35, 16  ;;  %v1031_v34 = vrot.slane %v1029_v54, 5  ;;  %v3267_v54 = vld [vmem:[#allocation2 + $0x28] sm:$0xf] }
  0x5e   : > { %v3259_v48 = vrot.slane %v905_v1, 4  ;;  %v922_v28 = vshll.u32 %v3250_v46, 16  ;;  %1894 = vmatprep.mubr.bf16.mxu1 %v2290_v11  ;;  %v2286_v32 = vcombine.low %v799_v22, %v803_v58  ;;  %v735_v60 = vshll.u32 %v3253_v35, 16  ;;  %v3283_v11 = vld [vmem:[#allocation2 + $0x2c] sm:$0x1] }
  0x5f   : > { %v3263_v3 = vrot.slane %v908_v29, 5  ;;  %v734_v50 = vrot.slane %v732_v24, 4  ;;  %v743_v5 = vrot.slane %v741_v39, 5  ;;  %v1013_v6 = vrot.slane %v1012_v47, 4 }
  0x60   : > { %1895 = vmatmul.mubr.bf16.gmra.mrb[12].mxu1 %v2286_v32  ;;  %v737_v30 = vrot.slane %v735_v60, 5  ;;  %v1027_v0 = vrot.slane %v1026_v7, 4  ;;  %v832_v17 = vrot.slane %v830_v38, 5  ;;  %v846_v18 = vrot.slane %v844_v51, 5  ;;  %v814_v51 = vld [vmem:[#allocation2 + $0x1c] sm:$0x1] }
  0x61   : > { %v1018_v22 = vsel %vm2938_vm11, %v1013_v6, %v1017_v53  ;;  %v2259_v23 = vrot.slane %v932_v37, 9  ;;  %v958_v41 = vrot.slane %v812_v42, 5  ;;  %v2260_v46 = vrot.slane %v933_v2, 9  ;;  %v934_v37 = vld [vmem:[#allocation2 + $0x18] sm:$0xe]  ;;  %v3300_v60 = vld [vmem:[%s3507_s3 + $0x208] sm:$0xff]  }
  0x62   : > { %v738_v1 = vor.u32 %v737_v30, %v734_v50  ;;  %v1032_v47 = vsel %vm2938_vm11, %v1027_v0, %v1031_v34  ;;  %v962_v29 = vrot.slane %v813_v25, 5  ;;  %v833_v7 = vsel %vm2938_vm11, %v3222_v15, %v832_v17  ;;  %v815_v17 = vld [vmem:[#allocation2 + $0x24] sm:$0x1] }
  0x63   : > { %v2303_v31 = vcombine.low %v1018_v22, %v1032_v47  ;;  %v959_v40 = vsel %vm2908_vm8, %v2259_v23, %v958_v41  ;;  %v847_v53 = vsel %vm2938_vm11, %v3227_v16, %v846_v18  ;;  %v1034_v42 = vshrl.u32 %v3265_v8, 16 }
  0x64   : > { %v739_v39 = vrot.slane %v738_v1, 4  ;;  %v963_v25 = vsel %vm2908_vm8, %v2260_v46, %v962_v29  ;;  %v3288_v38 = vcombine.low %v833_v7, %v847_v53  ;;  %v1037_v15 = vshll.u32 %v3265_v8, 16  ;;  %v3319_v1 = vld [vmem:[#allocation2 + $0x38] sm:$0xf] }
  0x65   : > { %v2278_v58 = vcombine.low %v3176_v62, %v3253_v35  ;;  %2000 = vmatprep.mubr.bf16.mxu1 %v2303_v31  ;;  %v1036_v24 = vrot.slane %v1034_v42, 4  ;;  %v1043_v16 = vshll.u32 %v3269_v26, 16  ;;  %v1048_v34 = vshrl.u32 %v3267_v54, 16  ;;  %v935_v35 = vld [vmem:[#allocation2 + $0x20] sm:$0xe] }
  0x66   : > { %v744_v32 = vsel %vm2938_vm11, %v739_v39, %v743_v5  ;;  %v1039_v2 = vrot.slane %v1037_v15, 5  ;;  %v1051_v50 = vshll.u32 %v3267_v54, 16  ;;  %v1057_v62 = vshll.u32 %v3283_v11, 16 }
  0x67   : > { %v3304_v6 = vrot.slane %v919_v52, 4  ;;  %v2282_v30 = vcombine.low %v730_v49, %v744_v32  ;;  %v2295_v5 = vcombine.low %v959_v40, %v963_v25  ;;  %v1050_v0 = vrot.slane %v1048_v34, 4  ;;  %v3316_v52 = vld [vmem:[#allocation2 + $0x30] sm:$0xf] }
  0x68   : > { %v3311_v18 = vrot.slane %v922_v28, 5  ;;  %2001 = vmatmul.mubr.bf16.vlgmr.msra.gmra.mrb[16].mxu1 %v2299_v12  ;;  %v1040_v22 = vor.u32 %v1039_v2, %v1036_v24  ;;  %v1045_v23 = vrot.slane %v1043_v16, 5  ;;  %v1053_v41 = vrot.slane %v1051_v50, 5  ;;  %v3321_v28 = vld [vmem:[#allocation2 + $0x34] sm:$0x1] }
  0x69   : > { %1829 = vmatprep.mubr.bf16.mxu0 %v2282_v30  ;;  %2599 = vmatpush3.bf16.msra.mxu1 %v3142_v59  ;;  %v1059_v46 = vrot.slane %v1057_v62, 5  ;;  %v2261_v33 = vrot.slane %v934_v37, 9  ;;  %v966_v9 = vrot.slane %v814_v51, 5  ;;  %v2262_v49 = vrot.slane %v935_v35, 9  ;;  %v3327_v12 = vld [vmem:[%s3507_s3 + $0x210] sm:$0xff]   ;;  %v3353_v35 = vld [vmem:[%s3507_s3 + $0x218] sm:$0xff]  }
  0x6a   : > { %1830 = vmatmul.mubr.bf16.gmra.mrb[12].mxu0 %v2278_v58  ;;  %2592 = vmatprep.subr.bf16.mxu1 %v3300_v60  ;;  %v1041_v57 = vrot.slane %v1040_v22, 4  ;;  %v1054_v43 = vor.u32 %v1053_v41, %v1050_v0  ;;  %v970_v47 = vrot.slane %v815_v17, 5  ;;  %v858_v29 = vshll.u32 %v814_v51, 16  ;;  %v816_v2 = vld [vmem:[#allocation2 + $0x2c] sm:$0x1] }
  0x6b   : > { %1935 = vmatprep.mubr.bf16.mxu0 %v2295_v5  ;;  %v2300_v7 = vcombine.low %v3265_v8, %v3267_v54  ;;  %v872_v31 = vshll.u32 %v815_v17, 16  ;;  %v1062_v40 = vshrl.u32 %v3316_v52, 16  ;;  %v1065_v53 = vshll.u32 %v3316_v52, 16  ;;  %v3340_v8 = vld [vmem:[#allocation2 + $0x3c] sm:$0x1] }
  0x6c   : > { %v1046_v42 = vsel %vm2938_vm11, %v1041_v57, %v1045_v23  ;;  %v1055_v39 = vrot.slane %v1054_v43, 4  ;;  %v967_v25 = vsel %vm2908_vm8, %v2261_v33, %v966_v9  ;;  %v860_v15 = vrot.slane %v858_v29, 5  ;;  %v936_v50 = vld [vmem:[#allocation2 + $0x28] sm:$0xe]  ;;  %v937_v17 = vld [vmem:[#allocation2 + $0x30] sm:$0xe] }
  0x6d   : > { %2600 = vmatpush3.bf16.msra.mxu1 %v3300_v60  ;;  %v971_v51 = vsel %vm2908_vm8, %v2262_v49, %v970_v47  ;;  %v874_v58 = vrot.slane %v872_v31, 5  ;;  %v1064_v54 = vrot.slane %v1062_v40, 4  ;;  %v1067_v24 = vrot.slane %v1065_v53, 5  ;;  %v467_v33 = vld [vmem:[#allocation2 + $0x44] sm:$0x1] }
  0x6e   : > { %v1060_v16 = vsel %vm2938_vm11, %v1055_v39, %v1059_v46  ;;  %2593 = vmatprep.subr.bf16.mxu1 %v3327_v12  ;;  %v861_v34 = vsel %vm2938_vm11, %v3235_v14, %v860_v15  ;;  %v1071_v37 = vshll.u32 %v3321_v28, 16  ;;  %v1076_v32 = vshrl.u32 %v3319_v1, 16  ;;  %v817_v14 = vld [vmem:[#allocation2 + $0x34] sm:$0x1]  ;;  %v3366_v47 = vld [vmem:[#allocation2 + $0x40] sm:$0xf] }
  0x6f   : > { %v2304_v62 = vcombine.low %v1046_v42, %v1060_v16  ;;  %v875_v30 = vsel %vm2938_vm11, %v3237_v63, %v874_v58  ;;  %v1068_v5 = vor.u32 %v1067_v24, %v1064_v54  ;;  %v1079_v0 = vshll.u32 %v3319_v1, 16  ;;  %v3364_v63 = vld [vmem:[%s3507_s3 + $0x220] sm:$0xff]   ;;  %v3368_v29 = vld [vmem:[#allocation2 + $0x48] sm:$0xf]  ;;  %v3371_v39 = vld [vmem:[#allocation2 + $0x4c] sm:$0x1] }
  0x70   : > { %v2296_v22 = vcombine.low %v967_v25, %v971_v51  ;;  %v1073_v23 = vrot.slane %v1071_v37, 5  ;;  %v1078_v41 = vrot.slane %v1076_v32, 4  ;;  %v1085_v46 = vshll.u32 %v3340_v8, 16 }
  0x71   : > { %2008 = vmatprep.mubr.bf16.mxu1 %v2304_v62  ;;  %2601 = vmatpush3.bf16.msra.mxu1 %v3327_v12  ;;  %v2292_v9 = vcombine.low %v861_v34, %v875_v30  ;;  %v1069_v49 = vrot.slane %v1068_v5, 4  ;;  %v1081_v57 = vrot.slane %v1079_v0, 5  ;;  %v2263_v43 = vrot.slane %v936_v50, 9  ;;  %v938_v34 = vld [vmem:[#allocation2 + $0x38] sm:$0xe] }
  0x72   : > { %1936 = vmatmul.mubr.bf16.vlgmr.msra.gmra.mrb[16].mxu0 %v3288_v38  ;;  %2009 = vmatmul.mubr.bf16.gmra.mrb[20].mxu1 %v2300_v7  ;;  %v1087_v31 = vrot.slane %v1085_v46, 5  ;;  %v974_v40 = vrot.slane %v816_v2, 5  ;;  %v2264_v53 = vrot.slane %v937_v17, 9  ;;  %v978_v42 = vrot.slane %v817_v14, 5  ;;  %v818_v50 = vld [vmem:[#allocation2 + $0x3c] sm:$0x1] }
  0x73   : > { %2568 = vmatpush3.bf16.msra.mxu0 %v3142_v59  ;;  %2594 = vmatprep.subr.bf16.mxu1 %v3353_v35  ;;  %v1082_v25 = vor.u32 %v1081_v57, %v1078_v41  ;;  %v2301_v15 = vcombine.low %v3316_v52, %v3319_v1  ;;  %v884_v51 = vrot.slane %v883_v36, 4  ;;  %v886_v38 = vshll.u32 %v816_v2, 16  ;;  %v939_v62 = vld [vmem:[#allocation2 + $0x40] sm:$0xe]  ;;  %v1121_v17 = vld [vmem:[#allocation2 + $0x30] sm:$0xe] }
  0x74   : > { %2569 = vmatprep.subr.bf16.mxu0 %v3300_v60  ;;  %1943 = vmatprep.mubr.bf16.mxu0 %v2296_v22  ;;  %v1074_v7 = vsel %vm2938_vm11, %v1069_v49, %v1073_v23  ;;  %v975_v59 = vsel %vm2908_vm8, %v2263_v43, %v974_v40  ;;  %v898_v58 = vrot.slane %v897_v45, 4  ;;  %v900_v54 = vshll.u32 %v817_v14, 16  ;;  %v3419_v46 = vld [vmem:[%s3507_s3 + $0x230] sm:$0xff]   ;;  %v3429_v40 = vld [vmem:[%s3507_s3 + $0x238] sm:$0xff]  }
  0x75   : > { %2602 = vmatpush3.bf16.msra.mxu1 %v3353_v35  ;;  %v1083_v52 = vrot.slane %v1082_v25, 4  ;;  %v979_v4 = vsel %vm2908_vm8, %v2264_v53, %v978_v42  ;;  %v888_v10 = vrot.slane %v886_v38, 5  ;;  %v468_v36 = vsel %vm2883_vm5, %v398_v19, %v467_v33  ;;  %v1122_v42 = vld [vmem:[#allocation2 + $0x38] sm:$0xe] }
  0x76   : > { %2595 = vmatprep.subr.bf16.mxu1 %v3364_v63  ;;  %v902_v1 = vrot.slane %v900_v54, 5  ;;  %469 = vst [vmem:[#allocation2 + $0x44] sm:$0x1] %v468_v36  ;;  %v1090_v13 = vshrl.u32 %v3366_v47, 16  ;;  %v1093_v20 = vshll.u32 %v3366_v47, 16  ;;  %v1104_v45 = vshrl.u32 %v3368_v29, 16 }
  0x77   : > { %2570 = vmatpush3.bf16.msra.mxu0 %v3300_v60  ;;  %v1088_v24 = vsel %vm2938_vm11, %v1083_v52, %v1087_v31  ;;  %v889_v27 = vsel %vm2938_vm11, %v884_v51, %v888_v10  ;;  %v1107_v19 = vshll.u32 %v3368_v29, 16  ;;  %v1113_v16 = vshll.u32 %v3371_v39, 16  ;;  %v1124_v52 = vld [vmem:[#allocation2 + $0x48] sm:$0xe]  ;;  %v1117_v36 = vld [vmem:[#allocation2 + $0x10] sm:$0xe] }
  0x78   : > { %2571 = vmatprep.subr.bf16.mxu0 %v3327_v12  ;;  %v2305_v37 = vcombine.low %v1074_v7, %v1088_v24  ;;  %v903_v60 = vsel %vm2938_vm11, %v898_v58, %v902_v1  ;;  %v1092_v32 = vrot.slane %v1090_v13, 4  ;;  %v1095_v2 = vrot.slane %v1093_v20, 5 }
  0x79   : > { %2603 = vmatpush3.bf16.msra.mxu1 %v3364_v63  ;;  %v2297_v30 = vcombine.low %v975_v59, %v979_v4  ;;  %v2293_v5 = vcombine.low %v889_v27, %v903_v60  ;;  %v1106_v0 = vrot.slane %v1104_v45, 4  ;;  %v1109_v14 = vrot.slane %v1107_v19, 5  ;;  %v1123_v59 = vld [vmem:[#allocation2 + $0x40] sm:$0xe] }
  0x7a   : > { %1944 = vmatmul.mubr.bf16.gmra.mrb[20].mxu0 %v2292_v9  ;;  %2016 = vmatprep.mubr.bf16.mxu1 %v2305_v37  ;;  %v1096_v22 = vor.u32 %v1095_v2, %v1092_v32  ;;  %v1115_v23 = vrot.slane %v1113_v16, 5  ;;  %v1171_v41 = vrot.slane %v3371_v39, 5  ;;  %v2265_v33 = vrot.slane %v938_v34, 9  ;;  %v1118_v37 = vld [vmem:[#allocation2 + $0x18] sm:$0xe] }
  0x7b   : > { %2572 = vmatpush3.bf16.msra.mxu0 %v3327_v12  ;;  %2017 = vmatmul.mubr.bf16.gmra.mrb[24].mxu1 %v2301_v15  ;;  %v1110_v49 = vor.u32 %v1109_v14, %v1106_v0  ;;  %v982_v57 = vrot.slane %v818_v50, 5  ;;  %v2266_v43 = vrot.slane %v939_v62, 9  ;;  %v911_v9 = vor.u32 %v3263_v3, %v3259_v48 }
  0x7c   : > { %2573 = vmatprep.subr.bf16.mxu0 %v3353_v35  ;;  %2596 = vmatprep.subr.bf16.mxu1 %v3405_v56  ;;  %v1097_v31 = vrot.slane %v1096_v22, 4  ;;  %v914_v53 = vshll.u32 %v818_v50, 16  ;;  %v925_v12 = vor.u32 %v3311_v18, %v3304_v6  ;;  %v2271_v25 = vrot.slane %v1121_v17, 9 }
  0x7d   : > { %2604 = vmatpush3.bf16.msra.mxu1 %v3405_v56  ;;  %1951 = vmatprep.mubr.bf16.mxu0 %v2297_v30  ;;  %v1003_v48 = vld [vmem:[#allocation2 + $0x44] sm:$0x1]  ;;  %v1111_v3 = vrot.slane %v1110_v49, 4  ;;  %v2302_v15 = vcombine.low %v3366_v47, %v3368_v29  ;;  %v983_v38 = vsel %vm2908_vm8, %v2265_v33, %v982_v57  ;;  %v912_v7 = vrot.slane %v911_v9, 4  ;;  %v1119_v30 = vld [vmem:[#allocation2 + $0x20] sm:$0xe] }
  0x7e   : > { %v819_v51 = vld [vmem:[#allocation2 + $0x44] sm:$0x1]  ;;  %v1099_v58 = vshll.u32 %v1003_v48, 16  ;;  %v1167_v54 = vrot.slane %v1003_v48, 5  ;;  %2597 = vmatprep.subr.bf16.mxu1 %v3419_v46  ;;  %v916_v18 = vrot.slane %v914_v53, 5  ;;  %v926_v10 = vrot.slane %v925_v12, 4 }
  0x7f   : > { %v986_v6 = vrot.slane %v819_v51, 5  ;;  %2574 = vmatpush3.bf16.msra.mxu0 %v3353_v35  ;;  %v1116_v4 = vsel %vm2938_vm11, %v1111_v3, %v1115_v23  ;;  %v928_v47 = vshll.u32 %v819_v51, 16  ;;  %v1159_v29 = vrot.slane %v3321_v28, 5 }
  0x80   : > { %2575 = vmatprep.subr.bf16.mxu0 %v3364_v63  ;;  %v1101_v1 = vrot.slane %v1099_v58, 5  ;;  %v917_v20 = vsel %vm2938_vm11, %v912_v7, %v916_v18  ;;  %v2272_v45 = vrot.slane %v1122_v42, 9  ;;  %v1163_v28 = vrot.slane %v3340_v8, 5 }
  0x81   : > { %v987_v13 = vsel %vm2908_vm8, %v2266_v43, %v986_v6  ;;  %2605 = vmatpush3.bf16.msra.mxu1 %v3419_v46  ;;  %v930_v24 = vrot.slane %v928_v47, 5  ;;  %v1160_v27 = vsel %vm2908_vm8, %v2271_v25, %v1159_v29  ;;  %v2273_v16 = vrot.slane %v1123_v59, 9 }
  0x82   : > { %v2298_v35 = vcombine.low %v983_v38, %v987_v13  ;;  %1952 = vmatmul.mubr.bf16.gmra.mrb[24].mxu0 %v2293_v5  ;;  %v1102_v19 = vsel %vm2938_vm11, %v1097_v31, %v1101_v1  ;;  %2598 = vmatprep.subr.bf16.mxu1 %v3429_v40  ;;  %v2274_v34 = vrot.slane %v1124_v52, 9  ;;  %v2267_v60 = vrot.slane %v1117_v36, 9  ;;  %v1120_v5 = vld [vmem:[#allocation2 + $0x28] sm:$0xe] }
  0x83   : > { %v2306_v32 = vcombine.low %v1102_v19, %v1116_v4  ;;  %2576 = vmatpush3.bf16.msra.mxu0 %v3364_v63  ;;  %v931_v2 = vsel %vm2938_vm11, %v926_v10, %v930_v24  ;;  %v1164_v8 = vsel %vm2908_vm8, %v2272_v45, %v1163_v28  ;;  %v1143_v50 = vrot.slane %v3192_v44, 5 }
  0x84   : > { %1959 = vmatprep.mubr.bf16.mxu0 %v2298_v35  ;;  %2577 = vmatprep.subr.bf16.mxu0 %v3405_v56  ;;  %v2309_v62 = vcombine.low %v1160_v27, %v1164_v8  ;;  %v2268_v0 = vrot.slane %v1118_v37, 9  ;;  %v1147_v55 = vrot.slane %v3207_v61, 5  ;;  %v1151_v14 = vrot.slane %v3269_v26, 5 }
  0x85   : > { %2024 = vmatprep.mubr.bf16.mxu1 %v2306_v32  ;;  %2606 = vmatpush3.bf16.msra.mxu1 %v3429_v40  ;;  %v1144_v63 = vsel %vm2908_vm8, %v2267_v60, %v1143_v50  ;;  %v1155_v17 = vrot.slane %v3283_v11, 5  ;;  %v2294_v44 = vcombine.low %v917_v20, %v931_v2  ;;  %v1168_v22 = vsel %vm2908_vm8, %v2273_v16, %v1167_v54 }
  0x86   : > { %2025 = vmatmul.mubr.bf16.gmra.mrb[28].mxu1 %v2302_v15  ;;  %v1172_v23 = vsel %vm2908_vm8, %v2274_v34, %v1171_v41  ;;  %v1148_v61 = vsel %vm2908_vm8, %v2268_v0, %v1147_v55  ;;  %v2269_v33 = vrot.slane %v1119_v30, 9  ;;  %v2270_v26 = vrot.slane %v1120_v5, 9 }
  0x87   : > { %2578 = vmatpush3.bf16.msra.mxu0 %v3405_v56  ;;  %2587 = vmatprep.mubr.bf16.mxu1 %v2309_v62  ;;  %v2307_v11 = vcombine.low %v1144_v63, %v1148_v61  ;;  %v2310_v49 = vcombine.low %v1168_v22, %v1172_v23 }
  0x88   : > { %2579 = vmatprep.subr.bf16.mxu0 %v3419_v46  ;;  %v1152_v56 = vsel %vm2908_vm8, %v2269_v33, %v1151_v14  ;;  %v1156_v39 = vsel %vm2908_vm8, %v2270_v26, %v1155_v17 }
  0x89   : > { %v2308_v41 = vcombine.low %v1152_v56, %v1156_v39 }
  0x8a   : > { %1960 = vmatmul.mubr.bf16.gmra.mrb[28].mxu0 %v2294_v44 }
  0x8b   : > { %2580 = vmatpush3.bf16.msra.mxu0 %v3419_v46  ;;  %2583 = vmatprep.mubr.bf16.mxu0 %v2307_v11 }
  0x8c   : > { %2581 = vmatprep.subr.bf16.mxu0 %v3429_v40 }
  0x8e   : > { %2588 = vmatmul.mubr.bf16.vlgmr.msra.gmra.mrb[32].mxu1 %v2310_v49 }
  0x8f   : > { %2582 = vmatpush3.bf16.msra.mxu0 %v3429_v40 }
  0x92   : > { %2584 = vmatmul.mubr.bf16.vlgmr.msra.gmra.mrb[32].mxu0 %v2308_v41 }
 0x104   : > { %v2451_v57 = vpop.f32.mrb[0].mxu1 }
 0x105   : > { %v2452_v43 = vpop.f32.mrb[1].mxu1 }
 0x106   : > { %v2453_v9 = vadd.f32 %v2452_v43, %v2451_v57  ;;  %v2454_v31 = vpop.f32.mrb[2].mxu1 }
 0x107   : > { %v2455_v53 = vpop.f32.mrb[3].mxu1 }
 0x108   : > { %v2456_v46 = vadd.f32 %v2455_v53, %v2454_v31 }
 0x10c   : > { %v2411_v12 = vpop.f32.mrb[0].mxu0 }
 0x10d   : > { %v2412_v42 = vpop.f32.mrb[1].mxu0 }
 0x10e   : > { %v2413_v25 = vadd.f32 %v2412_v42, %v2411_v12  ;;  %v2414_v48 = vpop.f32.mrb[2].mxu0 }
 0x10f   : > { %v2415_v3 = vpop.f32.mrb[3].mxu0  ;;  %v2457_v38 = vpop.f32.mrb[4].mxu1 }
 0x110   : > { %v1873_v21 = vadd.f32 %v2453_v9, %v2413_v25  ;;  %v2416_v15 = vadd.f32 %v2415_v3, %v2414_v48  ;;  %v2458_v7 = vpop.f32.mrb[5].mxu1 }
 0x111   : > { %v2459_v59 = vadd.f32 %v2458_v7, %v2457_v38  ;;  %v2460_v58 = vpop.f32.mrb[6].mxu1 }
 0x112   : > { %v1876_v51 = vadd.f32 %v2456_v46, %v2416_v15  ;;  %v2461_v40 = vpop.f32.mrb[7].mxu1 }
 0x113   : > { %v2462_v54 = vadd.f32 %v2461_v40, %v2460_v58 }
 0x118   : > { %v2417_v6 = vpop.f32.mrb[4].mxu0 }
 0x119   : > { %v2418_v18 = vpop.f32.mrb[5].mxu0 }
 0x11a   : > { %v2419_v52 = vadd.f32 %v2418_v18, %v2417_v6  ;;  %v2420_v4 = vpop.f32.mrb[6].mxu0 }
 0x11b   : > { %v2421_v10 = vpop.f32.mrb[7].mxu0 }
 0x11c   : > { %v1881_v47 = vadd.f32 %v2459_v59, %v2419_v52  ;;  %v2422_v29 = vadd.f32 %v2421_v10, %v2420_v4 }
 0x11e   : > { %v3485_v36 = vadd.f32 %v2462_v54, %v2422_v29 }
 0x124   : > { %v2463_v1 = vpop.f32.mrb[8].mxu1 }
 0x125   : > { %v2464_v13 = vpop.f32.mrb[9].mxu1 }
 0x126   : > { %v2465_v20 = vadd.f32 %v2464_v13, %v2463_v1  ;;  %v2466_v45 = vpop.f32.mrb[10].mxu1 }
 0x127   : > { %v2467_v35 = vpop.f32.mrb[11].mxu1 }
 0x128   : > { %v2468_v24 = vadd.f32 %v2467_v35, %v2466_v45 }
 0x12b   : > { %v2423_v27 = vpop.f32.mrb[8].mxu0 }
 0x12c   : > { %v2424_v28 = vpop.f32.mrb[9].mxu0 }
 0x12d   : > { %v2425_v19 = vadd.f32 %v2424_v28, %v2423_v27  ;;  %v2426_v16 = vpop.f32.mrb[10].mxu0 }
 0x12e   : > { %v2427_v34 = vpop.f32.mrb[11].mxu0 }
 0x12f   : > { %v1889_v37 = vadd.f32 %v2465_v20, %v2425_v19  ;;  %v2428_v60 = vadd.f32 %v2427_v34, %v2426_v16 }
 0x131   : > { %v1892_v32 = vadd.f32 %v2468_v24, %v2428_v60 }
 0x133   : > { %v2469_v2 = vpop.f32.mrb[12].mxu1 }
 0x134   : > { %v2470_v8 = vpop.f32.mrb[13].mxu1 }
 0x135   : > { %v2471_v50 = vadd.f32 %v2470_v8, %v2469_v2  ;;  %v2472_v62 = vpop.f32.mrb[14].mxu1 }
 0x136   : > { %v2473_v30 = vpop.f32.mrb[15].mxu1 }
 0x137   : > { %v2474_v5 = vadd.f32 %v2473_v30, %v2472_v62 }
 0x13b   : > { %v2531_v63 = vpop.f32.mrb[16].mxu1 }
 0x13c   : > { %v2532_v0 = vpop.f32.mrb[17].mxu1 }
 0x13d   : > { %v2429_v55 = vpop.f32.mrb[12].mxu0  ;;  %v2533_v14 = vadd.f32 %v2532_v0, %v2531_v63  ;;  %v2534_v17 = vpop.f32.mrb[18].mxu1 }
 0x13e   : > { %v2430_v44 = vpop.f32.mrb[13].mxu0  ;;  %v2535_v22 = vpop.f32.mrb[19].mxu1 }
 0x13f   : > { %v2431_v23 = vadd.f32 %v2430_v44, %v2429_v55  ;;  %v2432_v61 = vpop.f32.mrb[14].mxu0  ;;  %v2536_v33 = vadd.f32 %v2535_v22, %v2534_v17 }
 0x140   : > { %v2433_v26 = vpop.f32.mrb[15].mxu0 }
 0x141   : > { %v1897_v11 = vadd.f32 %v2471_v50, %v2431_v23  ;;  %v2434_v49 = vadd.f32 %v2433_v26, %v2432_v61 }
 0x143   : > { %v1900_v56 = vadd.f32 %v2474_v5, %v2434_v49 }
 0x145   : > { %v2491_v39 = vpop.f32.mrb[16].mxu0  ;;  %v2537_v41 = vpop.f32.mrb[20].mxu1 }
 0x146   : > { %v2492_v57 = vpop.f32.mrb[17].mxu0  ;;  %v2538_v43 = vpop.f32.mrb[21].mxu1 }
 0x147   : > { %v2493_v9 = vadd.f32 %v2492_v57, %v2491_v39  ;;  %v2494_v31 = vpop.f32.mrb[18].mxu0  ;;  %v2539_v53 = vadd.f32 %v2538_v43, %v2537_v41  ;;  %v2540_v46 = vpop.f32.mrb[22].mxu1 }
 0x148   : > { %v2495_v12 = vpop.f32.mrb[19].mxu0  ;;  %v2541_v42 = vpop.f32.mrb[23].mxu1 }
 0x149   : > { %v1938_v25 = vadd.f32 %v2493_v9, %v1873_v21  ;;  %v2496_v48 = vadd.f32 %v2495_v12, %v2494_v31  ;;  %v2542_v3 = vadd.f32 %v2541_v42, %v2540_v46 }
 0x14b   : > { %v1941_v15 = vadd.f32 %v2496_v48, %v1876_v51  ;;  %v2003_v38 = vadd.f32 %v2533_v14, %v1938_v25 }
 0x14d   : > { %v2497_v7 = vpop.f32.mrb[20].mxu0  ;;  %v3487_v59 = vadd.f32 %v2536_v33, %v1941_v15 }
 0x14e   : > { %v2498_v58 = vpop.f32.mrb[21].mxu0  ;;  %v2543_v40 = vpop.f32.mrb[24].mxu1 }
 0x14f   : > { %v2499_v54 = vadd.f32 %v2498_v58, %v2497_v7  ;;  %v2500_v6 = vpop.f32.mrb[22].mxu0  ;;  %v2544_v18 = vpop.f32.mrb[25].mxu1 }
 0x150   : > { %v2501_v52 = vpop.f32.mrb[23].mxu0  ;;  %v2545_v4 = vadd.f32 %v2544_v18, %v2543_v40  ;;  %v2546_v10 = vpop.f32.mrb[26].mxu1 }
 0x151   : > { %v1946_v29 = vadd.f32 %v2499_v54, %v1881_v47  ;;  %v2502_v1 = vadd.f32 %v2501_v52, %v2500_v6  ;;  %v2547_v13 = vpop.f32.mrb[27].mxu1 }
 0x152   : > { %v2548_v20 = vadd.f32 %v2547_v13, %v2546_v10 }
 0x153   : > { %v1949_v21 = vadd.f32 %v2502_v1, %v3485_v36  ;;  %v2011_v45 = vadd.f32 %v2539_v53, %v1946_v29 }
 0x155   : > { %v2503_v51 = vpop.f32.mrb[24].mxu0  ;;  %v2014_v35 = vadd.f32 %v2542_v3, %v1949_v21 }
 0x156   : > { %v2504_v24 = vpop.f32.mrb[25].mxu0 }
 0x157   : > { %v2505_v27 = vadd.f32 %v2504_v24, %v2503_v51  ;;  %v2506_v28 = vpop.f32.mrb[26].mxu0 }
 0x158   : > { %v2507_v19 = vpop.f32.mrb[27].mxu0 }
 0x159   : > { %v1954_v16 = vadd.f32 %v2505_v27, %v1889_v37  ;;  %v2508_v34 = vadd.f32 %v2507_v19, %v2506_v28  ;;  %v2549_v60 = vpop.f32.mrb[28].mxu1 }
 0x15a   : > { %v2550_v2 = vpop.f32.mrb[29].mxu1 }
 0x15b   : > { %v1957_v8 = vadd.f32 %v2508_v34, %v1892_v32  ;;  %v2551_v50 = vadd.f32 %v2550_v2, %v2549_v60  ;;  %v2552_v47 = vpop.f32.mrb[30].mxu1  ;;  %v2019_v62 = vadd.f32 %v2545_v4, %v1954_v16 }
 0x15c   : > { %v2553_v30 = vpop.f32.mrb[31].mxu1 }
 0x15d   : > { %v2509_v5 = vpop.f32.mrb[28].mxu0  ;;  %v2554_v63 = vadd.f32 %v2553_v30, %v2552_v47  ;;  %v2022_v36 = vadd.f32 %v2548_v20, %v1957_v8 }
 0x15e   : > { %v2510_v0 = vpop.f32.mrb[29].mxu0 }
 0x15f   : > { %v2511_v55 = vadd.f32 %v2510_v0, %v2509_v5  ;;  %v2512_v14 = vpop.f32.mrb[30].mxu0 }
 0x160   : > { %v2513_v17 = vpop.f32.mrb[31].mxu0 }
 0x161   : > { %v1962_v44 = vadd.f32 %v2511_v55, %v1897_v11  ;;  %v2589_v22 = vpop.f32.mrb[32].mxu1  ;;  %v2514_v23 = vadd.f32 %v2513_v17, %v2512_v14 }
 0x162   : > { %v2083_v37 = vpop.f32.mrb[33].mxu1 }
 0x163   : > { %v2027_v32 = vadd.f32 %v2551_v50, %v1962_v44  ;;  %v2084_v61 = vadd.f32 %v2083_v37, %v2019_v62  ;;  %v1965_v33 = vadd.f32 %v2514_v23, %v1900_v56  ;;  %v2590_v26 = vpop.f32.mrb[34].mxu1 }
 0x164   : > { %v2086_v49 = vpop.f32.mrb[35].mxu1 }
 0x165   : > { %v2092_v39 = vadd.f32 %v2589_v22, %v2027_v32  ;;  %2138 = vst [vmem:[%s231_s17 + $0x20] sm:$0xff] %v2084_v61  ;;  %v2030_v41 = vadd.f32 %v2554_v63, %v1965_v33  ;;  %v2087_v57 = vadd.f32 %v2086_v49, %v2022_v36  ;;  %v2585_v43 = vpop.f32.mrb[32].mxu0 }
 0x166   : > { %v2076_v9 = vadd.f32 %v2585_v43, %v2011_v45  ;;  %v2067_v11 = vpop.f32.mrb[33].mxu0 }
 0x167   : > { %2140 = vst [vmem:[%s231_s17 + $0x30] sm:$0xff] %v2092_v39  ;;  %v2095_v31 = vadd.f32 %v2590_v26, %v2030_v41  ;;  %2139 = vst [vmem:[%s231_s17 + $0x28] sm:$0xff] %v2087_v57  ;;  %v2068_v53 = vadd.f32 %v2067_v11, %v2003_v38  ;;  %v2586_v46 = vpop.f32.mrb[34].mxu0  ;;  %v2116_v38 = vmul.f32 %v2084_v61, %v2084_v61 }
 0x168   : > { %2136 = vst [vmem:[%s231_s17 + $0x10] sm:$0xff] %v2076_v9  ;;  %v2079_v12 = vadd.f32 %v2586_v46, %v2014_v35  ;;  %v2070_v42 = vpop.f32.mrb[35].mxu0  ;;  %v2114_v15 = vmul.f32 %v2076_v9, %v2076_v9  ;;  %v2117_v4 = vmul.f32 %v2087_v57, %v2087_v57  ;;  %v2118_v1 = vmul.f32 %v2092_v39, %v2092_v39 }
 0x169   : > { %2141 = vst [vmem:[%s231_s17 + $0x38] sm:$0xff] %v2095_v31  ;;  %2134 = vst [vmem:[%s231_s17] sm:$0xff] %v2068_v53  ;;  %v2071_v56 = vadd.f32 %v2070_v42, %v3487_v59  ;;  %v2112_v25 = vmul.f32 %v2068_v53, %v2068_v53  ;;  %v2119_v20 = vmul.f32 %v2095_v31, %v2095_v31 }
 0x16a   : > { %2137 = vst [vmem:[%s231_s17 + $0x18] sm:$0xff] %v2079_v12  ;;  %v2115_v40 = vmul.f32 %v2079_v12, %v2079_v12 }
 0x16b   : > { %v2098_v48 = vadd.f32 %v2071_v56, %v2068_v53  ;;  %v2113_v3 = vmul.f32 %v2071_v56, %v2071_v56  ;;  %2135 = vst [vmem:[%s231_s17 + $0x8] sm:$0xff] %v2071_v56 }
 0x16d   : > { %v2099_v7 = vadd.f32 %v2098_v48, %v2076_v9  ;;  %v2120_v58 = vadd.f32 %v2113_v3, %v2112_v25 }
 0x16f   : > { %v2100_v54 = vadd.f32 %v2099_v7, %v2079_v12  ;;  %v2121_v6 = vadd.f32 %v2120_v58, %v2114_v15 }
 0x171   : > { %v2101_v18 = vadd.f32 %v2100_v54, %v2084_v61  ;;  %v2122_v52 = vadd.f32 %v2121_v6, %v2115_v40 }
 0x173   : > { %v2102_v10 = vadd.f32 %v2101_v18, %v2087_v57  ;;  %v2123_v29 = vadd.f32 %v2122_v52, %v2116_v38 }
 0x175   : > { %v2103_v59 = vadd.f32 %v2102_v10, %v2092_v39  ;;  %v2124_v13 = vadd.f32 %v2123_v29, %v2117_v4 }
 0x177   : > { %v2104_v21 = vadd.f32 %v2103_v59, %v2095_v31  ;;  %v2125_v45 = vadd.f32 %v2124_v13, %v2118_v1 }
 0x179   : > { %v2105_v51 = vrot.slane %v2104_v21, 4  ;;  %v2126_v35 = vadd.f32 %v2125_v45, %v2119_v20 }
 0x17b   : > { %v2106_v24 = vadd.f32 %v2105_v51, %v2104_v21  ;;  %v2127_v27 = vrot.slane %v2126_v35, 4 }
 0x17d   : > { %v2107_v28 = vrot.slane %v2106_v24, 2  ;;  %v2128_v19 = vadd.f32 %v2127_v27, %v2126_v35 }
 0x17f   : > { %v2108_v16 = vadd.f32 %v2107_v28, %v2106_v24  ;;  %v2129_v34 = vrot.slane %v2128_v19, 2 }
 0x181   : > { %v2109_v60 = vrot.slane %v2108_v16, 1  ;;  %v2130_v2 = vadd.f32 %v2129_v34, %v2128_v19 }
 0x183   : > { %v2131_v8 = vrot.slane %v2130_v2, 1  ;;  %v2110_v50 = vadd.f32 %v2109_v60, %v2108_v16 }
 0x185   : > { %v2132_v47 = vadd.f32 %v2131_v8, %v2130_v2 }
 0x187   : > { %v2143_v62 = vsel %vm422_vm3, %v2110_v50, %v2132_v47 }
 0x188   : > { %2144 = vst [vmem:[%s235_s21] sm:$0x3] %v2143_v62 }
 0x189 PF: > { %s16_s18 = sadd.s32 1, %s2706_s18  }
 0x18a   : > { %p13_p4 = scmp.ge.s32.totalorder %s16_s18, 4  }
 0x18c   :  { %15 = sbr.rel (!%p13_p4) target bundleno = 1 (0x1), region = 80 }

</bundles_post_ra>
